<compile_context>
chip_gen: v7x
topology: tpu7x:2x2x1
jax: 0.10.0
libtpu: 0.0.40
codegen_flags: <defaults>
</compile_context>

<pallas_src>
import math

import jax
import jax.numpy as jnp
from jax.experimental import pallas as pl
from jax.experimental.pallas import tpu as pltpu


def encoder_layer_kernel(x_ref, wq_ref, wk_ref, wv_ref, woh_ref, bo_ref,
                         w1_ref, b1_ref, w2_ref, b2_ref,
                         g1_ref, be1_ref, g2_ref, be2_ref,
                         out_ref, attn_ref, assoc_ref):
    # One grid step == one batch element.
    x = x_ref[0]                                   # (S, D) f32
    S, D = x.shape
    H = attn_ref.shape[1]
    dk = D // H
    scale = 1.0 / math.sqrt(dk)

    xb = x.astype(jnp.bfloat16)

    # --- QKV projections: bf16 inputs, f32 accumulation on the MXU ---
    Q = jnp.dot(xb, wq_ref[...], preferred_element_type=jnp.float32) * scale
    K = jnp.dot(xb, wk_ref[...], preferred_element_type=jnp.float32)
    V = jnp.dot(xb, wv_ref[...], preferred_element_type=jnp.float32)

    # Split heads: (S, D) -> (H, S, dk).  Static lane slices stacked along a new
    # leading (major) axis -- no minor-dim transposes, no lane-axis concat.
    def split_heads(t):
        return jnp.stack(
            [t[:, h * dk:(h + 1) * dk] for h in range(H)], axis=0
        ).astype(jnp.bfloat16)

    Qh = split_heads(Q)                            # (H, S, dk) bf16
    Kh = split_heads(K)
    Vh = split_heads(V)

    # --- batched attention over all heads at once ---
    scores = jnp.einsum('hqd,hkd->hqk', Qh, Kh,
                        preferred_element_type=jnp.float32)      # (H, S, S) f32
    scores = scores - jnp.max(scores, axis=-1, keepdims=True)
    e = jnp.exp(scores)
    denom = jnp.sum(e, axis=-1, keepdims=True)
    probs = e * pl.reciprocal(denom, approx=True)                # softmax (H, S, S)
    attn_ref[0] = probs.astype(attn_ref.dtype)                   # all heads, one store

    ctx = jnp.einsum('hqk,hkd->hqd', probs.astype(jnp.bfloat16), Vh,
                     preferred_element_type=jnp.float32)         # (H, S, dk)

    # Output projection: per-head weight slab (H, dk, D); batched matmul, then
    # reduce over heads  ==  concat(context_h) @ W_o, without the concat.
    proj = jnp.einsum('hsd,hde->hse', ctx.astype(jnp.bfloat16), woh_ref[...],
                      preferred_element_type=jnp.float32)        # (H, S, D)
    attn_out = proj[0]
    for h in range(1, H):
        attn_out = attn_out + proj[h]
    attn_out = attn_out + bo_ref[...]                            # (S, D)

    # --- association discrepancy: KL(avg_attn || uniform prior) per row ---
    avg = probs[0]
    for h in range(1, H):
        avg = avg + probs[h]
    eps = 1e-8
    a = avg * (1.0 / H) + eps                                    # (S, S)
    inv_prior = 1.0 / (1.0 / S + eps)
    kl = jnp.sum(a * jnp.log(a * inv_prior), axis=-1, keepdims=True)  # (S, 1)
    assoc_ref[0] = jnp.transpose(kl)                             # lane-dense (1, S)

    # --- residual + LayerNorm + FFN + residual + LayerNorm (f32) ---
    def layernorm(h, g, b):
        mu = jnp.mean(h, axis=-1, keepdims=True)
        var = jnp.mean((h - mu) ** 2, axis=-1, keepdims=True)
        return (h - mu) * jax.lax.rsqrt(var + 1e-5) * g + b

    h1 = layernorm(x + attn_out, g1_ref[...], be1_ref[...])
    ff = jnp.dot(h1.astype(jnp.bfloat16), w1_ref[...],
                 preferred_element_type=jnp.float32) + b1_ref[...]
    ff = jnp.maximum(ff, 0.0)
    ff = jnp.dot(ff.astype(jnp.bfloat16), w2_ref[...],
                 preferred_element_type=jnp.float32) + b2_ref[...]
    out = layernorm(h1 + ff, g2_ref[...], be2_ref[...])
    out_ref[0] = out.astype(out_ref.dtype)


def transformer_encoder_layer(x, params, n_heads, *, attn_dtype=jnp.float32):
    B, S, D = x.shape
    F = params["w1"].shape[1]
    H = n_heads
    assert D % H == 0, "d_model must be divisible by n_heads"
    dk = D // H

    # bf16 weights at the boundary: native MXU dtype + half the HBM->VMEM DMA bytes.
    wq = params["wq"].astype(jnp.bfloat16)
    wk = params["wk"].astype(jnp.bfloat16)
    wv = params["wv"].astype(jnp.bfloat16)
    # W_o rows h*dk..(h+1)*dk multiply head h's context; reshape to per-head slabs.
    woh = params["wo"].reshape(H, dk, D).astype(jnp.bfloat16)
    w1 = params["w1"].astype(jnp.bfloat16)
    w2 = params["w2"].astype(jnp.bfloat16)

    # Grid-invariant weights/biases: constant index_map across the batch grid,
    # single-buffered so VMEM is not double-allocated for them.
    def const_spec(shape):
        zeros = (0,) * len(shape)
        return pl.BlockSpec(shape, lambda b, _z=zeros: _z,
                            pipeline_mode=pl.Buffered(1))

    grid_spec = pltpu.PrefetchScalarGridSpec(
        num_scalar_prefetch=0,
        grid=(B,),
        in_specs=[
            pl.BlockSpec((1, S, D), lambda b: (b, 0, 0)),   # x
            const_spec((D, D)),                             # wq
            const_spec((D, D)),                             # wk
            const_spec((D, D)),                             # wv
            const_spec((H, dk, D)),                         # wo (per-head slabs)
            const_spec((1, D)),                             # bo
            const_spec((D, F)),                             # w1
            const_spec((1, F)),                             # b1
            const_spec((F, D)),                             # w2
            const_spec((1, D)),                             # b2
            const_spec((1, D)),                             # gamma1
            const_spec((1, D)),                             # beta1
            const_spec((1, D)),                             # gamma2
            const_spec((1, D)),                             # beta2
        ],
        out_specs=[
            pl.BlockSpec((1, S, D), lambda b: (b, 0, 0)),        # output
            pl.BlockSpec((1, H, S, S), lambda b: (b, 0, 0, 0)),  # attention
            pl.BlockSpec((1, 1, S), lambda b: (b, 0, 0)),        # association (lane-dense)
        ],
    )

    # Scoped-VMEM sizing from the actual block footprint (default is only 16/32 MiB);
    # cap at 64 MiB so the same setting is safe on v7x.
    f32b, bf16b = 4, 2
    est = (
        2 * (S * D) * f32b                       # x blocks (double-buffered)
        + 2 * (S * D) * f32b                     # output blocks
        + 2 * (H * S * S) * f32b                 # attention output blocks
        + 2 * S * f32b                           # association blocks
        + (3 * D * D + H * dk * D + D * F + F * D) * bf16b   # weights, single buffer
        + (6 * D + F) * 8 * f32b                 # biases / LN params (sublane padded)
        + (7 * S * D + 3 * H * S * S + H * S * D + S * F) * f32b  # in-kernel temporaries
    )
    vmem_limit = int(min(max(2 * est, 32 * 1024 * 1024), 64 * 1024 * 1024))

    out, attn, assoc = pl.pallas_call(
        encoder_layer_kernel,
        out_shape=(
            jax.ShapeDtypeStruct((B, S, D), jnp.float32),
            jax.ShapeDtypeStruct((B, H, S, S), attn_dtype),
            jax.ShapeDtypeStruct((B, 1, S), jnp.float32),
        ),
        grid_spec=grid_spec,
        compiler_params=pltpu.CompilerParams(
            dimension_semantics=("parallel",),
            vmem_limit_bytes=vmem_limit),
    )(x, wq, wk, wv, woh, params["bo"],
      w1, params["b1"], w2, params["b2"],
      params["g1"], params["be1"], params["g2"], params["be2"])

    return out, attn, assoc[:, 0, :]


def init_params(key, d_model, d_ff):
    ks = jax.random.split(key, 8)
    s = 0.05
    return {
        "wq": s * jax.random.normal(ks[0], (d_model, d_model), jnp.float32),
        "wk": s * jax.random.normal(ks[1], (d_model, d_model), jnp.float32),
        "wv": s * jax.random.normal(ks[2], (d_model, d_model), jnp.float32),
        "wo": s * jax.random.normal(ks[3], (d_model, d_model), jnp.float32),
        "bo": s * jax.random.normal(ks[4], (1, d_model), jnp.float32),
        "w1": s * jax.random.normal(ks[5], (d_model, d_ff), jnp.float32),
        "b1": s * jax.random.normal(ks[6], (1, d_ff), jnp.float32),
        "w2": s * jax.random.normal(ks[7], (d_ff, d_model), jnp.float32),
        "b2": jnp.zeros((1, d_model), jnp.float32),
        "g1": jnp.ones((1, d_model), jnp.float32),
        "be1": jnp.zeros((1, d_model), jnp.float32),
        "g2": jnp.ones((1, d_model), jnp.float32),
        "be2": jnp.zeros((1, d_model), jnp.float32),
    }


if __name__ == "__main__":
    B, S, D, H, FF = 2, 8, 32, 4, 64
    key = jax.random.PRNGKey(0)
    kx, kp = jax.random.split(key)
    x = jax.random.normal(kx, (B, S, D), jnp.float32)
    params = init_params(kp, D, FF)

    out, attn, assoc = transformer_encoder_layer(x, params, n_heads=H)
    jax.block_until_ready((out, attn, assoc))

    assert out.shape == (B, S, D)
    assert attn.shape == (B, H, S, S)
    assert assoc.shape == (B, S)
    assert bool(jnp.all(jnp.isfinite(out)))
    assert bool(jnp.all(jnp.isfinite(attn)))
    assert bool(jnp.all(jnp.isfinite(assoc)))
    print("KERNEL_OK")
</pallas_src>

<mosaic_0001>
module attributes {stable_mosaic.version = 11 : i64} {
  func.func @encoder_layer_kernel(%arg0: i32, %arg1: memref<1x8x32xf32, #tpu.memory_space<vmem>>, %arg2: memref<32x32xbf16, #tpu.memory_space<vmem>>, %arg3: memref<32x32xbf16, #tpu.memory_space<vmem>>, %arg4: memref<32x32xbf16, #tpu.memory_space<vmem>>, %arg5: memref<4x8x32xbf16, #tpu.memory_space<vmem>>, %arg6: memref<1x32xf32, #tpu.memory_space<vmem>>, %arg7: memref<32x64xbf16, #tpu.memory_space<vmem>>, %arg8: memref<1x64xf32, #tpu.memory_space<vmem>>, %arg9: memref<64x32xbf16, #tpu.memory_space<vmem>>, %arg10: memref<1x32xf32, #tpu.memory_space<vmem>>, %arg11: memref<1x32xf32, #tpu.memory_space<vmem>>, %arg12: memref<1x32xf32, #tpu.memory_space<vmem>>, %arg13: memref<1x32xf32, #tpu.memory_space<vmem>>, %arg14: memref<1x32xf32, #tpu.memory_space<vmem>>, %arg15: memref<1x8x32xf32, #tpu.memory_space<vmem>>, %arg16: memref<1x4x8x8xf32, #tpu.memory_space<vmem>>, %arg17: memref<1x1x8xf32, #tpu.memory_space<vmem>>) attributes {dimension_semantics = [#tpu.dimension_semantics<parallel>], iteration_bounds = array<i64: 2>, scalar_prefetch = 0 : i64, scratch_operands = 0 : i64, tpu.core_type = #tpu.core_type<tc>, window_params = [{transform_indices = @transform_0, window_bounds = array<i64: 1, 8, 32>}, {pipeline_mode = #tpu.pipeline_mode<synchronous>, transform_indices = @transform_1, window_bounds = array<i64: 32, 32>}, {pipeline_mode = #tpu.pipeline_mode<synchronous>, transform_indices = @transform_2, window_bounds = array<i64: 32, 32>}, {pipeline_mode = #tpu.pipeline_mode<synchronous>, transform_indices = @transform_3, window_bounds = array<i64: 32, 32>}, {pipeline_mode = #tpu.pipeline_mode<synchronous>, transform_indices = @transform_4, window_bounds = array<i64: 4, 8, 32>}, {pipeline_mode = #tpu.pipeline_mode<synchronous>, transform_indices = @transform_5, window_bounds = array<i64: 1, 32>}, {pipeline_mode = #tpu.pipeline_mode<synchronous>, transform_indices = @transform_6, window_bounds = array<i64: 32, 64>}, {pipeline_mode = #tpu.pipeline_mode<synchronous>, transform_indices = @transform_7, window_bounds = array<i64: 1, 64>}, {pipeline_mode = #tpu.pipeline_mode<synchronous>, transform_indices = @transform_8, window_bounds = array<i64: 64, 32>}, {pipeline_mode = #tpu.pipeline_mode<synchronous>, transform_indices = @transform_9, window_bounds = array<i64: 1, 32>}, {pipeline_mode = #tpu.pipeline_mode<synchronous>, transform_indices = @transform_10, window_bounds = array<i64: 1, 32>}, {pipeline_mode = #tpu.pipeline_mode<synchronous>, transform_indices = @transform_11, window_bounds = array<i64: 1, 32>}, {pipeline_mode = #tpu.pipeline_mode<synchronous>, transform_indices = @transform_12, window_bounds = array<i64: 1, 32>}, {pipeline_mode = #tpu.pipeline_mode<synchronous>, transform_indices = @transform_13, window_bounds = array<i64: 1, 32>}, {transform_indices = @transform_14, window_bounds = array<i64: 1, 8, 32>}, {transform_indices = @transform_15, window_bounds = array<i64: 1, 4, 8, 8>}, {transform_indices = @transform_16, window_bounds = array<i64: 1, 1, 8>}]} {
    %c0 = arith.constant 0 : index
    %c0_0 = arith.constant 0 : index
    %c0_1 = arith.constant 0 : index
    %0 = vector.load %arg1[%c0, %c0_0, %c0_1] : memref<1x8x32xf32, #tpu.memory_space<vmem>>, vector<1x8x32xf32>
    %1 = vector.shape_cast %0 : vector<1x8x32xf32> to vector<8x32xf32>
    %2 = arith.truncf %1 : vector<8x32xf32> to vector<8x32xbf16>
    %c0_2 = arith.constant 0 : index
    %c0_3 = arith.constant 0 : index
    %3 = vector.load %arg2[%c0_2, %c0_3] : memref<32x32xbf16, #tpu.memory_space<vmem>>, vector<32x32xbf16>
    %cst = arith.constant dense<0.000000e+00> : vector<8x32xf32>
    %4 = tpu.matmul %2, %3, %cst {dimension_numbers = #tpu.dot_dimension_numbers<[1], [0], [0], [1], [0, 0, 1, 1], [], []>} : vector<8x32xbf16>, vector<32x32xbf16>, vector<8x32xf32> -> vector<8x32xf32>
    %cst_4 = arith.constant 0.353553385 : f32
    %5 = vector.broadcast %cst_4 : f32 to vector<8x32xf32>
    %6 = arith.mulf %4, %5 : vector<8x32xf32>
    %c0_5 = arith.constant 0 : index
    %c0_6 = arith.constant 0 : index
    %7 = vector.load %arg3[%c0_5, %c0_6] : memref<32x32xbf16, #tpu.memory_space<vmem>>, vector<32x32xbf16>
    %cst_7 = arith.constant dense<0.000000e+00> : vector<8x32xf32>
    %8 = tpu.matmul %2, %7, %cst_7 {dimension_numbers = #tpu.dot_dimension_numbers<[1], [0], [0], [1], [0, 0, 1, 1], [], []>} : vector<8x32xbf16>, vector<32x32xbf16>, vector<8x32xf32> -> vector<8x32xf32>
    %c0_8 = arith.constant 0 : index
    %c0_9 = arith.constant 0 : index
    %9 = vector.load %arg4[%c0_8, %c0_9] : memref<32x32xbf16, #tpu.memory_space<vmem>>, vector<32x32xbf16>
    %cst_10 = arith.constant dense<0.000000e+00> : vector<8x32xf32>
    %10 = tpu.matmul %2, %9, %cst_10 {dimension_numbers = #tpu.dot_dimension_numbers<[1], [0], [0], [1], [0, 0, 1, 1], [], []>} : vector<8x32xbf16>, vector<32x32xbf16>, vector<8x32xf32> -> vector<8x32xf32>
    %11 = vector.extract_strided_slice %6 {offsets = [0, 0], sizes = [8, 8], strides = [1, 1]} : vector<8x32xf32> to vector<8x8xf32>
    %12 = vector.extract_strided_slice %6 {offsets = [0, 8], sizes = [8, 8], strides = [1, 1]} : vector<8x32xf32> to vector<8x8xf32>
    %13 = vector.extract_strided_slice %6 {offsets = [0, 16], sizes = [8, 8], strides = [1, 1]} : vector<8x32xf32> to vector<8x8xf32>
    %14 = vector.extract_strided_slice %6 {offsets = [0, 24], sizes = [8, 8], strides = [1, 1]} : vector<8x32xf32> to vector<8x8xf32>
    %15 = vector.shape_cast %11 : vector<8x8xf32> to vector<1x8x8xf32>
    %16 = vector.shape_cast %12 : vector<8x8xf32> to vector<1x8x8xf32>
    %17 = vector.shape_cast %13 : vector<8x8xf32> to vector<1x8x8xf32>
    %18 = vector.shape_cast %14 : vector<8x8xf32> to vector<1x8x8xf32>
    %19 = tpu.concatenate %15, %16, %17, %18 in 0 : vector<1x8x8xf32>, vector<1x8x8xf32>, vector<1x8x8xf32>, vector<1x8x8xf32> -> vector<4x8x8xf32>
    %20 = arith.truncf %19 : vector<4x8x8xf32> to vector<4x8x8xbf16>
    %21 = vector.extract_strided_slice %8 {offsets = [0, 0], sizes = [8, 8], strides = [1, 1]} : vector<8x32xf32> to vector<8x8xf32>
    %22 = vector.extract_strided_slice %8 {offsets = [0, 8], sizes = [8, 8], strides = [1, 1]} : vector<8x32xf32> to vector<8x8xf32>
    %23 = vector.extract_strided_slice %8 {offsets = [0, 16], sizes = [8, 8], strides = [1, 1]} : vector<8x32xf32> to vector<8x8xf32>
    %24 = vector.extract_strided_slice %8 {offsets = [0, 24], sizes = [8, 8], strides = [1, 1]} : vector<8x32xf32> to vector<8x8xf32>
    %25 = vector.shape_cast %21 : vector<8x8xf32> to vector<1x8x8xf32>
    %26 = vector.shape_cast %22 : vector<8x8xf32> to vector<1x8x8xf32>
    %27 = vector.shape_cast %23 : vector<8x8xf32> to vector<1x8x8xf32>
    %28 = vector.shape_cast %24 : vector<8x8xf32> to vector<1x8x8xf32>
    %29 = tpu.concatenate %25, %26, %27, %28 in 0 : vector<1x8x8xf32>, vector<1x8x8xf32>, vector<1x8x8xf32>, vector<1x8x8xf32> -> vector<4x8x8xf32>
    %30 = arith.truncf %29 : vector<4x8x8xf32> to vector<4x8x8xbf16>
    %31 = vector.extract_strided_slice %10 {offsets = [0, 0], sizes = [8, 8], strides = [1, 1]} : vector<8x32xf32> to vector<8x8xf32>
    %32 = vector.extract_strided_slice %10 {offsets = [0, 8], sizes = [8, 8], strides = [1, 1]} : vector<8x32xf32> to vector<8x8xf32>
    %33 = vector.extract_strided_slice %10 {offsets = [0, 16], sizes = [8, 8], strides = [1, 1]} : vector<8x32xf32> to vector<8x8xf32>
    %34 = vector.extract_strided_slice %10 {offsets = [0, 24], sizes = [8, 8], strides = [1, 1]} : vector<8x32xf32> to vector<8x8xf32>
    %35 = vector.shape_cast %31 : vector<8x8xf32> to vector<1x8x8xf32>
    %36 = vector.shape_cast %32 : vector<8x8xf32> to vector<1x8x8xf32>
    %37 = vector.shape_cast %33 : vector<8x8xf32> to vector<1x8x8xf32>
    %38 = vector.shape_cast %34 : vector<8x8xf32> to vector<1x8x8xf32>
    %39 = tpu.concatenate %35, %36, %37, %38 in 0 : vector<1x8x8xf32>, vector<1x8x8xf32>, vector<1x8x8xf32>, vector<1x8x8xf32> -> vector<4x8x8xf32>
    %40 = arith.truncf %39 : vector<4x8x8xf32> to vector<4x8x8xbf16>
    "tpu.trace_start"() <{level = 10 : i32, message = "hqd,hkd->hqk"}> : () -> ()
    %cst_11 = arith.constant dense<0.000000e+00> : vector<4x8x8xf32>
    %41 = tpu.matmul %20, %30, %cst_11 {dimension_numbers = #tpu.dot_dimension_numbers<[2], [2], [1], [1], [0, 0, 0, 1, 1, 1], [0], [0]>} : vector<4x8x8xbf16>, vector<4x8x8xbf16>, vector<4x8x8xf32> -> vector<4x8x8xf32>
    "tpu.trace_stop"() : () -> ()
    %cst_12 = arith.constant dense<0xFF800000> : vector<4x8xf32>
    %42 = vector.multi_reduction <maximumf>, %41, %cst_12 [2] : vector<4x8x8xf32> to vector<4x8xf32>
    %43 = vector.shape_cast %42 : vector<4x8xf32> to vector<4x8x1xf32>
    %44 = vector.broadcast %43 : vector<4x8x1xf32> to vector<4x8x8xf32>
    %45 = arith.subf %41, %44 : vector<4x8x8xf32>
    %46 = math.exp %45 : vector<4x8x8xf32>
    %cst_13 = arith.constant dense<0.000000e+00> : vector<4x8xf32>
    %47 = vector.multi_reduction <add>, %46, %cst_13 [2] : vector<4x8x8xf32> to vector<4x8xf32>
    %48 = vector.shape_cast %47 : vector<4x8xf32> to vector<4x8x1xf32>
    %49 = tpu.reciprocal %48 {approx = true} : vector<4x8x1xf32> -> vector<4x8x1xf32>
    %50 = vector.broadcast %49 : vector<4x8x1xf32> to vector<4x8x8xf32>
    %51 = arith.mulf %46, %50 : vector<4x8x8xf32>
    %c0_14 = arith.constant 0 : index
    %c0_15 = arith.constant 0 : index
    %c0_16 = arith.constant 0 : index
    %c0_17 = arith.constant 0 : index
    %52 = vector.load %arg16[%c0_14, %c0_15, %c0_16, %c0_17] : memref<1x4x8x8xf32, #tpu.memory_space<vmem>>, vector<1x4x8x8xf32>
    %53 = vector.shape_cast %52 : vector<1x4x8x8xf32> to vector<4x8x8xf32>
    %54 = vector.shape_cast %51 : vector<4x8x8xf32> to vector<1x4x8x8xf32>
    tpu.vector_store %arg16[%c0_14, %c0_15, %c0_16, %c0_17], %54 {strides = array<i32>} : memref<1x4x8x8xf32, #tpu.memory_space<vmem>>, vector<1x4x8x8xf32>,
    %55 = arith.truncf %51 : vector<4x8x8xf32> to vector<4x8x8xbf16>
    "tpu.trace_start"() <{level = 10 : i32, message = "hqk,hkd->hqd"}> : () -> ()
    %cst_18 = arith.constant dense<0.000000e+00> : vector<4x8x8xf32>
    %56 = tpu.matmul %55, %40, %cst_18 {dimension_numbers = #tpu.dot_dimension_numbers<[2], [1], [1], [2], [0, 0, 0, 1, 1, 2], [0], [0]>} : vector<4x8x8xbf16>, vector<4x8x8xbf16>, vector<4x8x8xf32> -> vector<4x8x8xf32>
    "tpu.trace_stop"() : () -> ()
    %57 = arith.truncf %56 : vector<4x8x8xf32> to vector<4x8x8xbf16>
    %c0_19 = arith.constant 0 : index
    %c0_20 = arith.constant 0 : index
    %c0_21 = arith.constant 0 : index
    %58 = vector.load %arg5[%c0_19, %c0_20, %c0_21] : memref<4x8x32xbf16, #tpu.memory_space<vmem>>, vector<4x8x32xbf16>
    "tpu.trace_start"() <{level = 10 : i32, message = "hsd,hde->hse"}> : () -> ()
    %cst_22 = arith.constant dense<0.000000e+00> : vector<4x8x32xf32>
    %59 = tpu.matmul %57, %58, %cst_22 {dimension_numbers = #tpu.dot_dimension_numbers<[2], [1], [1], [2], [0, 0, 0, 1, 1, 2], [0], [0]>} : vector<4x8x8xbf16>, vector<4x8x32xbf16>, vector<4x8x32xf32> -> vector<4x8x32xf32>
    "tpu.trace_stop"() : () -> ()
    %60 = vector.extract_strided_slice %59 {offsets = [0, 0, 0], sizes = [1, 8, 32], strides = [1, 1, 1]} : vector<4x8x32xf32> to vector<1x8x32xf32>
    %61 = vector.shape_cast %60 : vector<1x8x32xf32> to vector<8x32xf32>
    %62 = vector.extract_strided_slice %59 {offsets = [1, 0, 0], sizes = [1, 8, 32], strides = [1, 1, 1]} : vector<4x8x32xf32> to vector<1x8x32xf32>
    %63 = vector.shape_cast %62 : vector<1x8x32xf32> to vector<8x32xf32>
    %64 = arith.addf %61, %63 : vector<8x32xf32>
    %65 = vector.extract_strided_slice %59 {offsets = [2, 0, 0], sizes = [1, 8, 32], strides = [1, 1, 1]} : vector<4x8x32xf32> to vector<1x8x32xf32>
    %66 = vector.shape_cast %65 : vector<1x8x32xf32> to vector<8x32xf32>
    %67 = arith.addf %64, %66 : vector<8x32xf32>
    %68 = vector.extract_strided_slice %59 {offsets = [3, 0, 0], sizes = [1, 8, 32], strides = [1, 1, 1]} : vector<4x8x32xf32> to vector<1x8x32xf32>
    %69 = vector.shape_cast %68 : vector<1x8x32xf32> to vector<8x32xf32>
    %70 = arith.addf %67, %69 : vector<8x32xf32>
    %c0_23 = arith.constant 0 : index
    %c0_24 = arith.constant 0 : index
    %71 = vector.load %arg6[%c0_23, %c0_24] : memref<1x32xf32, #tpu.memory_space<vmem>>, vector<1x32xf32>
    %72 = vector.broadcast %71 : vector<1x32xf32> to vector<8x32xf32>
    %73 = arith.addf %70, %72 : vector<8x32xf32>
    %74 = vector.extract_strided_slice %51 {offsets = [0, 0, 0], sizes = [1, 8, 8], strides = [1, 1, 1]} : vector<4x8x8xf32> to vector<1x8x8xf32>
    %75 = vector.shape_cast %74 : vector<1x8x8xf32> to vector<8x8xf32>
    %76 = vector.extract_strided_slice %51 {offsets = [1, 0, 0], sizes = [1, 8, 8], strides = [1, 1, 1]} : vector<4x8x8xf32> to vector<1x8x8xf32>
    %77 = vector.shape_cast %76 : vector<1x8x8xf32> to vector<8x8xf32>
    %78 = arith.addf %75, %77 : vector<8x8xf32>
    %79 = vector.extract_strided_slice %51 {offsets = [2, 0, 0], sizes = [1, 8, 8], strides = [1, 1, 1]} : vector<4x8x8xf32> to vector<1x8x8xf32>
    %80 = vector.shape_cast %79 : vector<1x8x8xf32> to vector<8x8xf32>
    %81 = arith.addf %78, %80 : vector<8x8xf32>
    %82 = vector.extract_strided_slice %51 {offsets = [3, 0, 0], sizes = [1, 8, 8], strides = [1, 1, 1]} : vector<4x8x8xf32> to vector<1x8x8xf32>
    %83 = vector.shape_cast %82 : vector<1x8x8xf32> to vector<8x8xf32>
    %84 = arith.addf %81, %83 : vector<8x8xf32>
    %cst_25 = arith.constant 2.500000e-01 : f32
    %85 = vector.broadcast %cst_25 : f32 to vector<8x8xf32>
    %86 = arith.mulf %84, %85 : vector<8x8xf32>
    %cst_26 = arith.constant 9.99999993E-9 : f32
    %87 = vector.broadcast %cst_26 : f32 to vector<8x8xf32>
    %88 = arith.addf %86, %87 : vector<8x8xf32>
    %cst_27 = arith.constant 7.99999952 : f32
    %89 = vector.broadcast %cst_27 : f32 to vector<8x8xf32>
    %90 = arith.mulf %88, %89 : vector<8x8xf32>
    %91 = math.log %90 : vector<8x8xf32>
    %92 = arith.mulf %88, %91 : vector<8x8xf32>
    %cst_28 = arith.constant dense<0.000000e+00> : vector<8xf32>
    %93 = vector.multi_reduction <add>, %92, %cst_28 [1] : vector<8x8xf32> to vector<8xf32>
    %94 = vector.shape_cast %93 : vector<8xf32> to vector<8x1xf32>
    %95 = tpu.transpose %94, [1, 0] : vector<8x1xf32> -> vector<1x8xf32>
    %c0_29 = arith.constant 0 : index
    %c0_30 = arith.constant 0 : index
    %c0_31 = arith.constant 0 : index
    %96 = vector.load %arg17[%c0_29, %c0_30, %c0_31] : memref<1x1x8xf32, #tpu.memory_space<vmem>>, vector<1x1x8xf32>
    %97 = vector.shape_cast %96 : vector<1x1x8xf32> to vector<1x8xf32>
    %98 = vector.shape_cast %95 : vector<1x8xf32> to vector<1x1x8xf32>
    tpu.vector_store %arg17[%c0_29, %c0_30, %c0_31], %98 {strides = array<i32>} : memref<1x1x8xf32, #tpu.memory_space<vmem>>, vector<1x1x8xf32>,
    %99 = arith.addf %1, %73 : vector<8x32xf32>
    %c0_32 = arith.constant 0 : index
    %c0_33 = arith.constant 0 : index
    %100 = vector.load %arg11[%c0_32, %c0_33] : memref<1x32xf32, #tpu.memory_space<vmem>>, vector<1x32xf32>
    %c0_34 = arith.constant 0 : index
    %c0_35 = arith.constant 0 : index
    %101 = vector.load %arg12[%c0_34, %c0_35] : memref<1x32xf32, #tpu.memory_space<vmem>>, vector<1x32xf32>
    %cst_36 = arith.constant dense<0.000000e+00> : vector<8xf32>
    %102 = vector.multi_reduction <add>, %99, %cst_36 [1] : vector<8x32xf32> to vector<8xf32>
    %103 = vector.shape_cast %102 : vector<8xf32> to vector<8x1xf32>
    %cst_37 = arith.constant 3.200000e+01 : f32
    %104 = vector.broadcast %cst_37 : f32 to vector<8x1xf32>
    %105 = arith.divf %103, %104 : vector<8x1xf32>
    %106 = vector.broadcast %105 : vector<8x1xf32> to vector<8x32xf32>
    %107 = arith.subf %99, %106 : vector<8x32xf32>
    %108 = arith.mulf %107, %107 : vector<8x32xf32>
    %cst_38 = arith.constant dense<0.000000e+00> : vector<8xf32>
    %109 = vector.multi_reduction <add>, %108, %cst_38 [1] : vector<8x32xf32> to vector<8xf32>
    %110 = vector.shape_cast %109 : vector<8xf32> to vector<8x1xf32>
    %cst_39 = arith.constant 3.200000e+01 : f32
    %111 = vector.broadcast %cst_39 : f32 to vector<8x1xf32>
    %112 = arith.divf %110, %111 : vector<8x1xf32>
    %113 = vector.broadcast %105 : vector<8x1xf32> to vector<8x32xf32>
    %114 = arith.subf %99, %113 : vector<8x32xf32>
    %cst_40 = arith.constant 9.99999974E-6 : f32
    %115 = vector.broadcast %cst_40 : f32 to vector<8x1xf32>
    %116 = arith.addf %112, %115 : vector<8x1xf32>
    %117 = math.rsqrt %116 : vector<8x1xf32>
    %118 = vector.broadcast %117 : vector<8x1xf32> to vector<8x32xf32>
    %119 = arith.mulf %114, %118 : vector<8x32xf32>
    %120 = vector.broadcast %100 : vector<1x32xf32> to vector<8x32xf32>
    %121 = arith.mulf %119, %120 : vector<8x32xf32>
    %122 = vector.broadcast %101 : vector<1x32xf32> to vector<8x32xf32>
    %123 = arith.addf %121, %122 : vector<8x32xf32>
    %124 = arith.truncf %123 : vector<8x32xf32> to vector<8x32xbf16>
    %c0_41 = arith.constant 0 : index
    %c0_42 = arith.constant 0 : index
    %125 = vector.load %arg7[%c0_41, %c0_42] : memref<32x64xbf16, #tpu.memory_space<vmem>>, vector<32x64xbf16>
    %cst_43 = arith.constant dense<0.000000e+00> : vector<8x64xf32>
    %126 = tpu.matmul %124, %125, %cst_43 {dimension_numbers = #tpu.dot_dimension_numbers<[1], [0], [0], [1], [0, 0, 1, 1], [], []>} : vector<8x32xbf16>, vector<32x64xbf16>, vector<8x64xf32> -> vector<8x64xf32>
    %c0_44 = arith.constant 0 : index
    %c0_45 = arith.constant 0 : index
    %127 = vector.load %arg8[%c0_44, %c0_45] : memref<1x64xf32, #tpu.memory_space<vmem>>, vector<1x64xf32>
    %128 = vector.broadcast %127 : vector<1x64xf32> to vector<8x64xf32>
    %129 = arith.addf %126, %128 : vector<8x64xf32>
    %cst_46 = arith.constant 0.000000e+00 : f32
    %130 = vector.broadcast %cst_46 : f32 to vector<8x64xf32>
    %131 = arith.maximumf %129, %130 : vector<8x64xf32>
    %132 = arith.truncf %131 : vector<8x64xf32> to vector<8x64xbf16>
    %c0_47 = arith.constant 0 : index
    %c0_48 = arith.constant 0 : index
    %133 = vector.load %arg9[%c0_47, %c0_48] : memref<64x32xbf16, #tpu.memory_space<vmem>>, vector<64x32xbf16>
    %cst_49 = arith.constant dense<0.000000e+00> : vector<8x32xf32>
    %134 = tpu.matmul %132, %133, %cst_49 {dimension_numbers = #tpu.dot_dimension_numbers<[1], [0], [0], [1], [0, 0, 1, 1], [], []>} : vector<8x64xbf16>, vector<64x32xbf16>, vector<8x32xf32> -> vector<8x32xf32>
    %c0_50 = arith.constant 0 : index
    %c0_51 = arith.constant 0 : index
    %135 = vector.load %arg10[%c0_50, %c0_51] : memref<1x32xf32, #tpu.memory_space<vmem>>, vector<1x32xf32>
    %136 = vector.broadcast %135 : vector<1x32xf32> to vector<8x32xf32>
    %137 = arith.addf %134, %136 : vector<8x32xf32>
    %138 = arith.addf %123, %137 : vector<8x32xf32>
    %c0_52 = arith.constant 0 : index
    %c0_53 = arith.constant 0 : index
    %139 = vector.load %arg13[%c0_52, %c0_53] : memref<1x32xf32, #tpu.memory_space<vmem>>, vector<1x32xf32>
    %c0_54 = arith.constant 0 : index
    %c0_55 = arith.constant 0 : index
    %140 = vector.load %arg14[%c0_54, %c0_55] : memref<1x32xf32, #tpu.memory_space<vmem>>, vector<1x32xf32>
    %cst_56 = arith.constant dense<0.000000e+00> : vector<8xf32>
    %141 = vector.multi_reduction <add>, %138, %cst_56 [1] : vector<8x32xf32> to vector<8xf32>
    %142 = vector.shape_cast %141 : vector<8xf32> to vector<8x1xf32>
    %cst_57 = arith.constant 3.200000e+01 : f32
    %143 = vector.broadcast %cst_57 : f32 to vector<8x1xf32>
    %144 = arith.divf %142, %143 : vector<8x1xf32>
    %145 = vector.broadcast %144 : vector<8x1xf32> to vector<8x32xf32>
    %146 = arith.subf %138, %145 : vector<8x32xf32>
    %147 = arith.mulf %146, %146 : vector<8x32xf32>
    %cst_58 = arith.constant dense<0.000000e+00> : vector<8xf32>
    %148 = vector.multi_reduction <add>, %147, %cst_58 [1] : vector<8x32xf32> to vector<8xf32>
    %149 = vector.shape_cast %148 : vector<8xf32> to vector<8x1xf32>
    %cst_59 = arith.constant 3.200000e+01 : f32
    %150 = vector.broadcast %cst_59 : f32 to vector<8x1xf32>
    %151 = arith.divf %149, %150 : vector<8x1xf32>
    %152 = vector.broadcast %144 : vector<8x1xf32> to vector<8x32xf32>
    %153 = arith.subf %138, %152 : vector<8x32xf32>
    %cst_60 = arith.constant 9.99999974E-6 : f32
    %154 = vector.broadcast %cst_60 : f32 to vector<8x1xf32>
    %155 = arith.addf %151, %154 : vector<8x1xf32>
    %156 = math.rsqrt %155 : vector<8x1xf32>
    %157 = vector.broadcast %156 : vector<8x1xf32> to vector<8x32xf32>
    %158 = arith.mulf %153, %157 : vector<8x32xf32>
    %159 = vector.broadcast %139 : vector<1x32xf32> to vector<8x32xf32>
    %160 = arith.mulf %158, %159 : vector<8x32xf32>
    %161 = vector.broadcast %140 : vector<1x32xf32> to vector<8x32xf32>
    %162 = arith.addf %160, %161 : vector<8x32xf32>
    %c0_61 = arith.constant 0 : index
    %c0_62 = arith.constant 0 : index
    %c0_63 = arith.constant 0 : index
    %163 = vector.load %arg15[%c0_61, %c0_62, %c0_63] : memref<1x8x32xf32, #tpu.memory_space<vmem>>, vector<1x8x32xf32>
    %164 = vector.shape_cast %163 : vector<1x8x32xf32> to vector<8x32xf32>
    %165 = vector.shape_cast %162 : vector<8x32xf32> to vector<1x8x32xf32>
    tpu.vector_store %arg15[%c0_61, %c0_62, %c0_63], %165 {strides = array<i32>} : memref<1x8x32xf32, #tpu.memory_space<vmem>>, vector<1x8x32xf32>,
    return
  }
  func.func @transform_0(%arg0: i32) -> (i32, i32, i32) {
    %c0_i32 = arith.constant 0 : i32
    %c0_i32_0 = arith.constant 0 : i32
    %c0_i32_1 = arith.constant 0 : i32
    return %arg0, %c0_i32, %c0_i32_0 : i32, i32, i32
  }
  func.func @transform_1(%arg0: i32) -> (i32, i32) {
    %c0_i32 = arith.constant 0 : i32
    %c0_i32_0 = arith.constant 0 : i32
    %c0_i32_1 = arith.constant 0 : i32
    return %c0_i32, %c0_i32_0 : i32, i32
  }
  func.func @transform_2(%arg0: i32) -> (i32, i32) {
    %c0_i32 = arith.constant 0 : i32
    %c0_i32_0 = arith.constant 0 : i32
    %c0_i32_1 = arith.constant 0 : i32
    return %c0_i32, %c0_i32_0 : i32, i32
  }
  func.func @transform_3(%arg0: i32) -> (i32, i32) {
    %c0_i32 = arith.constant 0 : i32
    %c0_i32_0 = arith.constant 0 : i32
    %c0_i32_1 = arith.constant 0 : i32
    return %c0_i32, %c0_i32_0 : i32, i32
  }
  func.func @transform_4(%arg0: i32) -> (i32, i32, i32) {
    %c0_i32 = arith.constant 0 : i32
    %c0_i32_0 = arith.constant 0 : i32
    %c0_i32_1 = arith.constant 0 : i32
    %c0_i32_2 = arith.constant 0 : i32
    return %c0_i32, %c0_i32_0, %c0_i32_1 : i32, i32, i32
  }
  func.func @transform_5(%arg0: i32) -> (i32, i32) {
    %c0_i32 = arith.constant 0 : i32
    %c0_i32_0 = arith.constant 0 : i32
    %c0_i32_1 = arith.constant 0 : i32
    return %c0_i32, %c0_i32_0 : i32, i32
  }
  func.func @transform_6(%arg0: i32) -> (i32, i32) {
    %c0_i32 = arith.constant 0 : i32
    %c0_i32_0 = arith.constant 0 : i32
    %c0_i32_1 = arith.constant 0 : i32
    return %c0_i32, %c0_i32_0 : i32, i32
  }
  func.func @transform_7(%arg0: i32) -> (i32, i32) {
    %c0_i32 = arith.constant 0 : i32
    %c0_i32_0 = arith.constant 0 : i32
    %c0_i32_1 = arith.constant 0 : i32
    return %c0_i32, %c0_i32_0 : i32, i32
  }
  func.func @transform_8(%arg0: i32) -> (i32, i32) {
    %c0_i32 = arith.constant 0 : i32
    %c0_i32_0 = arith.constant 0 : i32
    %c0_i32_1 = arith.constant 0 : i32
    return %c0_i32, %c0_i32_0 : i32, i32
  }
  func.func @transform_9(%arg0: i32) -> (i32, i32) {
    %c0_i32 = arith.constant 0 : i32
    %c0_i32_0 = arith.constant 0 : i32
    %c0_i32_1 = arith.constant 0 : i32
    return %c0_i32, %c0_i32_0 : i32, i32
  }
  func.func @transform_10(%arg0: i32) -> (i32, i32) {
    %c0_i32 = arith.constant 0 : i32
    %c0_i32_0 = arith.constant 0 : i32
    %c0_i32_1 = arith.constant 0 : i32
    return %c0_i32, %c0_i32_0 : i32, i32
  }
  func.func @transform_11(%arg0: i32) -> (i32, i32) {
    %c0_i32 = arith.constant 0 : i32
    %c0_i32_0 = arith.constant 0 : i32
    %c0_i32_1 = arith.constant 0 : i32
    return %c0_i32, %c0_i32_0 : i32, i32
  }
  func.func @transform_12(%arg0: i32) -> (i32, i32) {
    %c0_i32 = arith.constant 0 : i32
    %c0_i32_0 = arith.constant 0 : i32
    %c0_i32_1 = arith.constant 0 : i32
    return %c0_i32, %c0_i32_0 : i32, i32
  }
  func.func @transform_13(%arg0: i32) -> (i32, i32) {
    %c0_i32 = arith.constant 0 : i32
    %c0_i32_0 = arith.constant 0 : i32
    %c0_i32_1 = arith.constant 0 : i32
    return %c0_i32, %c0_i32_0 : i32, i32
  }
  func.func @transform_14(%arg0: i32) -> (i32, i32, i32) {
    %c0_i32 = arith.constant 0 : i32
    %c0_i32_0 = arith.constant 0 : i32
    %c0_i32_1 = arith.constant 0 : i32
    return %arg0, %c0_i32, %c0_i32_0 : i32, i32, i32
  }
  func.func @transform_15(%arg0: i32) -> (i32, i32, i32, i32) {
    %c0_i32 = arith.constant 0 : i32
    %c0_i32_0 = arith.constant 0 : i32
    %c0_i32_1 = arith.constant 0 : i32
    %c0_i32_2 = arith.constant 0 : i32
    return %arg0, %c0_i32, %c0_i32_0, %c0_i32_1 : i32, i32, i32, i32
  }
  func.func @transform_16(%arg0: i32) -> (i32, i32, i32) {
    %c0_i32 = arith.constant 0 : i32
    %c0_i32_0 = arith.constant 0 : i32
    %c0_i32_1 = arith.constant 0 : i32
    return %arg0, %c0_i32, %c0_i32_0 : i32, i32, i32
  }
}

</mosaic_0001>

<bundles_post_ra>
// kernel: tpu_custom_call.1
= control target key start
LH: loop header
LB: loop body
LE: loop exit
PB: predicated region body
PF: predicated region fallthrough
CT: control target
= control target key end

     0   :  { %s2989_s0 = inlined_call_operand.vmem [shape: f32[2,8,32], index: 0, kind: input, shape index: {}]   ;;  %s2990_s1 = inlined_call_operand.vmem [shape: bf16[32,32], index: 1, kind: input, shape index: {}]   ;;  %s2991_s2 = inlined_call_operand.vmem [shape: bf16[32,32], index: 2, kind: input, shape index: {}]   ;;  %s2992_s3 = inlined_call_operand.hbm [shape: bf16[32,32], index: 3, kind: input, shape index: {}]   ;;  %s2993_s4 = inlined_call_operand.hbm [shape: bf16[4,8,32], index: 4, kind: input, shape index: {}]   ;;  %s2994_s5 = inlined_call_operand.vmem [shape: f32[1,32], index: 5, kind: input, shape index: {}]   ;;  %s2995_s6 = inlined_call_operand.hbm [shape: bf16[32,64], index: 6, kind: input, shape index: {}]   ;;  %s2996_s7 = inlined_call_operand.vmem [shape: f32[1,64], index: 7, kind: input, shape index: {}]   ;;  %s2997_s8 = inlined_call_operand.vmem [shape: bf16[64,32], index: 8, kind: input, shape index: {}]   ;;  %s2998_s9 = inlined_call_operand.vmem [shape: f32[1,32], index: 9, kind: input, shape index: {}]   ;;  %s2999_s10 = inlined_call_operand.vmem [shape: f32[1,32], index: 10, kind: input, shape index: {}]   ;;  %s3000_s11 = inlined_call_operand.vmem [shape: f32[1,32], index: 11, kind: input, shape index: {}]   ;;  %s3001_s12 = inlined_call_operand.vmem [shape: f32[1,32], index: 12, kind: input, shape index: {}]   ;;  %s3002_s13 = inlined_call_operand.vmem [shape: f32[1,32], index: 13, kind: input, shape index: {}]   ;;  %s3003_s14 = inlined_call_operand.hbm [shape: f32[2,8,32], index: 14, kind: output, shape index: {0}]   ;;  %s3004_s15 = inlined_call_operand.hbm [shape: f32[2,4,8,8], index: 15, kind: output, shape index: {1}]   ;;  %s3005_s16 = inlined_call_operand.hbm [shape: f32[2,1,8], index: 16, kind: output, shape index: {2}]  }
   0x1   :  { %3020 = sst [smem:[#allocation22_spill]] %s2989_s0 }
   0x2   :  { %3021 = sst [smem:[#allocation23_spill]] %s2990_s1 }
   0x3   :  { %3022 = sst [smem:[#allocation24_spill]] %s3001_s12 }
   0x4   :  { %3023 = sst [smem:[#allocation25_spill]] %s3002_s13 }
   0x5   :  { %3024 = sst [smem:[#allocation26_spill]] %s3003_s14 }
   0x6   :  { %3025 = sst [smem:[#allocation27_spill]] %s3004_s15 }
   0x7   :  { %3026 = sst [smem:[#allocation28_spill]] %s3005_s16 }
   0x8   :  { %22 = vsyncpa [#allocation3], 0 }
   0x9   :  { %23 = vsyncpa [#allocation6], 0 }
   0xa   :  { %24 = vsyncpa [#allocation4], 0 }
   0xb   :  { %26 = vsyncpa [#allocation4 + $0x1], 0 }
   0xc   :  { %27 = vsyncpa [#allocation10], 0 }
   0xd   :  { %29 = vsyncpa [#allocation10 + $0x1], 0  ;;  %s2534_s21 = smov 0   ;;  %s2536_s22 = smov 0  }
   0xe   :  { %s2538_s23 = smov 0   ;;  %s2540_s24 = smov 0  }
   0xf LB: > { %3027 = sst [smem:[#allocation16_spill]] %s2420_s21  ;;  %s2555_s25 = sadd.s32 4294967295, %s2432_s24   ;;  %s2432_s24 = sphi %s2540_s24, %s3056_s24   ;;  %s2428_s23 = sphi %s2538_s23, %s3058_s23   ;;  %s2424_s22 = sphi %s2536_s22, %s3060_s22   ;;  %s2420_s21 = sphi %s2534_s21, %s3059_s21  }
  0x10   : > { %3028 = sst [smem:[#allocation17_spill]] %s2428_s23  ;;  %s3006_s26 = sadd.s32 4294967294, %s2432_s24  }
  0x11   : > { %3029 = sst [smem:[#allocation18_spill]] %s2432_s24  ;;  %s2559_s27 = sadd.s32 1, %s2432_s24  }
  0x12   : > { %3030 = sst [smem:[#allocation19_spill]] %s2559_s27  ;;  %s341_s28 = sadd.s32 1, %s2428_s23 }
  0x13   : > { %s338_s29 = ssub.s32 %s2432_s24, %s2559_s27  ;;  %p351_p0 = scmp.ne.s32.totalorder %s2428_s23, %s2424_s22 }
  0x14   : > { %p339_p1 = scmp.eq.s32.totalorder %s338_s29, 0  ;;  %p352_p2 = scmp.eq.s32.totalorder %s2555_s25, 1 }
  0x15   : > { %p357_p3 = scmp.ne.s32.totalorder %s2424_s22, %s2420_s21  ;;  %p358_p4 = scmp.eq.s32.totalorder %s3006_s26, 1 }
  0x16   : > { %s2572_s30 = scalar_select %p339_p1, %s2428_s23, %s341_s28  }
  0x17   : > { %p2574_p5 = por %p352_p2, %p351_p0  ;;  %p2578_p6 = por %p358_p4, %p357_p3 }
  0x18   : > { %3031 = sst [smem:[#allocation20_spill]] %s2572_s30  ;;  %p1881_p7 = scmp.ge.s32.totalorder %s2432_s24, 1 }
  0x19   : > { %s3032_s0 = scalar_select %p2574_p5, 1, 0 }
  0x1a   : > { %s3033_s17 = scalar_select %p2578_p6, 1, 0 }
  0x1b   : > { %p417_p8 = scmp.lt.s32.totalorder %s2432_s24, 3  ;;  %p3015_p9 = scmp.eq.s32.totalorder %s2555_s25, 0 }
  0x1c   : > { %3034 = sst [smem:[#allocation21_spill]] %s3033_s17  ;;  %s2434_s19 = smov [#allocation5]  }
  0x1d   : > { %p2585_p10 = pnand %p1881_p7, %p417_p8  ;;  %s448_s20 = sshll.u32 %s2434_s19, 4  ;;  %s2591_s20 = int_to_ptr.vmem [resolvable:$true] %s448_s20 }
  0x1e   : > { %s2435_s29 = smov [#allocation2]   ;;  %s2436_s30 = smov [#allocation7]  }
  0x1f   : > { %s3035_s18 = scalar_select %p2585_p10, 1, 0 }
  0x20   : > { %p2113_p11 = pneg %p2585_p10  ;;  %s435_s26 = sshll.u32 %s2435_s29, 4  ;;  %s2599_s26 = int_to_ptr.vmem [resolvable:$true] %s435_s26 }
  0x21   : > { %s2601_s23 = sshll.u32 %s2436_s30, 4  ;;  %s2218_s21 = scalar_lea.hbm %s2993_s4, 256  ;;  %s465_s23 = int_to_ptr.vmem [resolvable:$true] %s2601_s23 }
  0x22   : > { %p2595_p12 = pnand %p3015_p9, %p2113_p11  ;;  %p2219_p13 = scmp.ne.s32.totalorder %s2993_s4, %s2218_s21 }
  0x23   : > { %p2225_p3 = scmp.lt.u32.totalorder %s2218_s21, %s2993_s4 }
  0x24   : > { %p2611_p0 = pneg %p2595_p12 }
  0x26   : > { %p2221_p1 = pnand %p2611_p0, %p2219_p13 }
  0x28   : > { %p2222_p2 = pneg %p2221_p1 }
  0x2a   : > { %p2227_p4 = pnand %p2225_p3, %p2222_p2 }
  0x2c   : > { %2230 = shalt.err (!%p2227_p4)
}
  0x2d   : > { %s2231_s24 = scalar_lea.vmem %s2591_s20, 256  ;;  %p2239_p9 = scmp.lt.s32.totalorder %s2591_s20, %s2591_s20 }
  0x2e   : > { %p2232_p7 = scmp.ne.s32.totalorder %s2591_s20, %s2231_s24  ;;  %p2240_p6 = scmp.lt.s32.totalorder %s2231_s24, %s2231_s24 }
  0x30   : > { %p2234_p8 = pnand %p2232_p7, %p2611_p0  ;;  %p2241_p13 = por %p2240_p6, %p2239_p9 }
  0x32   : > { %p2235_p11 = pneg %p2234_p8 }
  0x34   : > { %p2242_p1 = pnand %p2241_p13, %p2235_p11 }
  0x36   : > { %2245 = shalt.err (!%p2242_p1)
}
  0x37   : > { %s2437_s27 = smov 64   ;;  %s2438_s21 = smov 4  }
  0x38   : > { %2119 = dma.hbm_to_vmem [thread:$0]  (!%p2595_p12), %s2993_s4, 256, %s2591_s20, [#allocation6], %s2437_s27, %s2437_s27, %s2438_s21  }
  0x39   : > { %s2246_s24 = scalar_lea.hbm %s2992_s3, 256 }
  0x3a   : > { %p2247_p6 = scmp.ne.s32.totalorder %s2992_s3, %s2246_s24  ;;  %p2253_p3 = scmp.lt.u32.totalorder %s2246_s24, %s2992_s3 }
  0x3c   : > { %p2249_p9 = pnand %p2247_p6, %p2611_p0 }
  0x3e   : > { %p2250_p2 = pneg %p2249_p9 }
  0x40   : > { %p2255_p4 = pnand %p2253_p3, %p2250_p2 }
  0x42   : > { %2258 = shalt.err (!%p2255_p4)
}
  0x43   : > { %s2259_s20 = scalar_lea.vmem %s2599_s26, 256  ;;  %p2267_p13 = scmp.lt.s32.totalorder %s2599_s26, %s2599_s26 }
  0x44   : > { %p2260_p7 = scmp.ne.s32.totalorder %s2599_s26, %s2259_s20  ;;  %p2268_p1 = scmp.lt.s32.totalorder %s2259_s20, %s2259_s20 }
  0x46   : > { %p2262_p8 = pnand %p2260_p7, %p2611_p0  ;;  %p2269_p6 = por %p2268_p1, %p2267_p13 }
  0x48   : > { %p2263_p11 = pneg %p2262_p8 }
  0x4a   : > { %p2270_p9 = pnand %p2269_p6, %p2263_p11 }
  0x4c   : > { %2273 = shalt.err (!%p2270_p9)
}
  0x4d   : > { %2116 = dma.hbm_to_vmem [thread:$0]  (!%p2595_p12), %s2992_s3, 256, %s2599_s26, [#allocation3], %s2437_s27, %s2437_s27, %s2438_s21  }
  0x4e   : > { %s2274_s17 = scalar_lea.hbm %s2995_s6, 256 }
  0x4f   : > { %p2275_p2 = scmp.ne.s32.totalorder %s2995_s6, %s2274_s17  ;;  %p2281_p7 = scmp.lt.u32.totalorder %s2274_s17, %s2995_s6 }
  0x51   : > { %p2277_p3 = pnand %p2275_p2, %p2611_p0 }
  0x53   : > { %p2278_p4 = pneg %p2277_p3 }
  0x55   : > { %p2283_p8 = pnand %p2281_p7, %p2278_p4 }
  0x57   : > { %2286 = shalt.err (!%p2283_p8)
}
  0x58   : > { %s2287_s20 = scalar_lea.vmem %s465_s23, 256  ;;  %p2295_p6 = scmp.lt.s32.totalorder %s465_s23, %s465_s23 }
  0x59   : > { %p2288_p11 = scmp.ne.s32.totalorder %s465_s23, %s2287_s20  ;;  %p2296_p9 = scmp.lt.s32.totalorder %s2287_s20, %s2287_s20 }
  0x5b   : > { %p2290_p13 = pnand %p2288_p11, %p2611_p0  ;;  %p2297_p5 = por %p2296_p9, %p2295_p6 }
  0x5d   : > { %p2291_p1 = pneg %p2290_p13 }
  0x5f   : > { %p2298_p10 = pnand %p2297_p5, %p2291_p1 }
  0x61   : > { %2301 = shalt.err (!%p2298_p10)
}
  0x62   : > { %2122 = dma.hbm_to_vmem [thread:$0]  (!%p2595_p12), %s2995_s6, 256, %s465_s23, [#allocation6], %s2437_s27, %s2437_s27, %s2438_s21  }
  0x63   : > { %p3038_p2 = scmp.ne.s32.totalorder %s3035_s18, 0 }
  0x64   : > { %p3039_p0 = scmp.eq.s32.totalorder (!%p3038_p2), %s2555_s25, 0 }
  0x65   : > { %508 = sbr.rel (%p3038_p2) target bundleno = 2516 (0x9d4), region = 76 }
  0x6c   : > { %2403 = dma.done.wait (%p3039_p0), [#allocation3], 256   ;;  %p3040_p3 = pmov %p3039_p0 }
  0x6d   : > { %p3041_p5 = pmov %p3039_p0 }
  0x6e   : > { %2405 = vsyncadd (%p3040_p3), [#allocation3], 4294967040 }
  0x6f   : > { %2407 = dma.done.wait (%p3041_p5), [#allocation6], 512   ;;  %p3042_p10 = pmov %p3039_p0 }
  0x70   : > { %p574_p4 = scmp.lt.s32.totalorder %s2555_s25, 1  ;;  %v2439_v0 = vmov 0.0   ;;  %vm2440_vm0 = vmmov 0   ;;  %s3043_s27 = sld [smem:[#allocation22_spill]]  ;;  %vm597_vm1 = vcmask 261120   ;;  %v2186_v4 = vld [vmem:[%s2991_s2] sm:$0xff]  }
  0x71   : > { %2409 = vsyncadd (%p3042_p10), [#allocation6], 4294966784  ;;  %1979 = vmatprep.subr.bf16.mxu1 %v2439_v0  ;;  %1983 = vmatprep.mubr.msk.bf16.mxu1 %vm2440_vm0, %v2439_v0  ;;  %s3044_s1 = sld [smem:[#allocation23_spill]]  ;;  %v2187_v6 = vld [vmem:[%s2991_s2 + $0x8] sm:$0xff]   ;;  %v2188_v7 = vld [vmem:[#allocation2] sm:$0xff]   ;;  %s2441_s20 = smov 120  }
  0x72   : > { %s575_s14 = scalar_select %p574_p4, %s2555_s25, 1  ;;  %1995 = vmatprep.subr.bf16.mxu0 %v2439_v0  ;;  %1999 = vmatprep.mubr.msk.bf16.mxu0 %vm2440_vm0, %v2439_v0  ;;  %v2189_v8 = vld [vmem:[#allocation2 + $0x8] sm:$0xff]   ;;  %vm796_vm2 = vcmask 64512   ;;  %vm1036_vm3 = vcmask 1043456   ;;  %vm1606_vm4 = vcmask 523264   ;;  %vm1465_vm5 = vcmask 57344  }
  0x73   : > { %1996 = vmatpush3.bf16.msra.mxu0 %v2188_v7  ;;  %s2442_s26 = smov 104   ;;  %s2443_s12 = smov 112  }
  0x74   : > { %s1892_s23 = sshll.u32 %s575_s14, 3  ;;  %1997 = vmatprep.subr.bf16.mxu0 %v2439_v0  ;;  %s2784_s14 = sand.u32 1, %s2424_s22  }
  0x75   : > { %s573_s15 = scalar_lea.vmem [#allocation11], %s2784_s14  ;;  %s1686_s16 = sand.u32 1, %s2555_s25  }
  0x76   : > { %s577_s21 = scalar_lea.vmem %s3043_s27, %s1892_s23  ;;  %s1891_s23 = sshll.u32 %s2784_s14, 5 }
  0x77   : > { %v2184_v1 = vld [vmem:[%s3044_s1] sm:$0xff]   ;;  %v2185_v2 = vld [vmem:[%s3044_s1 + $0x8] sm:$0xff]   ;;  %1998 = vmatpush3.bf16.msra.mxu0 %v2189_v8  ;;  %s2787_s18 = scalar_lea.vmem [#allocation9], %s1891_s23  ;;  %s1937_s17 = sshll.u32 %s2555_s25, 9 }
  0x78   : > { %1980 = vmatpush3.bf16.msra.mxu1 %v2184_v1  ;;  %v2710_v3 = vld [vmem:[%s577_s21] sm:$0xff]  ;;  %2009 = vmatprep.subr.bf16.mxu0 %v2439_v0  ;;  %s1717_s13 = sshll.u32 %s2787_s18, 4  ;;  %s3045_s30 = sld [smem:[#allocation27_spill]]  ;;  %s2876_s13 = int_to_ptr.vmem [resolvable:$true] %s1717_s13 }
  0x79   : > { %1981 = vmatprep.subr.bf16.mxu1 %v2439_v0  ;;  %v580_v5 = vpack.c.bf16 %v2710_v3, %v2710_v3  ;;  %p3046_p7 = scmp.ne.s32.totalorder %s3032_s0, 0 }
  0x7b   : > { %2000 = vmatmul.mubr.msk.bf16.vlgmr.msra.gmra.mrb[0].mxu0 %vm597_vm1, %v580_v5 }
  0x7c   : > { %1982 = vmatpush3.bf16.msra.mxu1 %v2185_v2  ;;  %2011 = vmatprep.mubr.msk.bf16.mxu0 %vm2440_vm0, %v2439_v0 }
  0x7d   : > { %1987 = vmatprep.subr.bf16.mxu1 %v2439_v0 }
  0x7e   : > { %s2886_s24 = scalar_lea.hbm %s3045_s30, %s1937_s17 }
  0x7f   : > { %1984 = vmatmul.mubr.msk.bf16.vlgmr.msra.gmra.mrb[0].mxu1 %vm597_vm1, %v580_v5 }
  0x80   : > { %1988 = vmatpush3.bf16.msra.mxu1 %v2186_v4  ;;  %1991 = vmatprep.mubr.msk.bf16.mxu1 %vm2440_vm0, %v2439_v0 }
  0x81   : > { %1989 = vmatprep.subr.bf16.mxu1 %v2439_v0 }
  0x84   : > { %1990 = vmatpush3.bf16.msra.mxu1 %v2187_v6 }
  0x85   : > { %2003 = vmatprep.subr.bf16.mxu1 %v2439_v0 }
  0x87   : > { %1992 = vmatmul.mubr.msk.bf16.vlgmr.msra.gmra.mrb[4].mxu1 %vm597_vm1, %v580_v5 }
  0x88   : > { %2005 = vmatprep.mubr.msk.bf16.mxu1 %vm2440_vm0, %v2439_v0 }
 0x14e   : > { %v2761_v36 = vpop.f32.mrb[0].mxu0 }
 0x14f   : > { %v2001_v37 = vpop.f32.mrb[1].mxu0  ;;  %v792_v38 = vpack.c.bf16 %v2761_v36, %v2761_v36 }
 0x150   : > { %v751_v39 = vpop.f32.mrb[2].mxu0 }
 0x151   : > { %v2002_v40 = vpop.f32.mrb[3].mxu0  ;;  %v1038_v41 = vsel %vm1036_vm3, %v792_v38, 0  ;;  %v1222_v39 = vld [vmem:[#allocation5] sm:$0xf] }
 0x152   : > { %v635_v9 = vpop.f32.mrb[0].mxu1 }
 0x153   : > { %v641_v10 = vmul.f32 0.35355338, %v635_v9  ;;  %v1985_v11 = vpop.f32.mrb[1].mxu1 }
 0x154   : > { %v638_v12 = vpop.f32.mrb[2].mxu1 }
 0x155   : > { %755 = vrot.lane.b32.xlu1 %v641_v10, %s2441_s20  ;;  %v1986_v13 = vpop.f32.mrb[3].mxu1  ;;  %v764_v20 = vpack.c.bf16 %v641_v10, %v641_v10 }
 0x15a   : > { %v692_v14 = vpop.f32.mrb[4].mxu1 }
 0x15b   : > { %775 = vrot.lane.b32.xlu1 %v692_v14, %s2442_s26  ;;  %769 = vrot.lane.b32.xlu0 %v692_v14, %s2441_s20  ;;  %v1993_v15 = vpop.f32.mrb[5].mxu1  ;;  %v778_v16 = vpack.c.bf16 %v692_v14, %v692_v14 }
 0x15c   : > { %v695_v17 = vpop.f32.mrb[6].mxu1 }
 0x15d   : > { %v1994_v18 = vpop.f32.mrb[7].mxu1  ;;  %v801_v19 = vsel %vm796_vm2, %v778_v16, 0 }
 0x15e   : > { %2004 = vmatpush3.bf16.xpose.msra.mxu1 %v801_v19 }
 0x15f   : > { %761 = vrot.lane.b32.xlu1 %v641_v10, %s2442_s26  ;;  %772 = vrot.lane.b32.xlu0 %v692_v14, %s2443_s12 }
 0x160   : > { %2015 = vmatprep.subr.bf16.mxu1 %v2439_v0 }
 0x163   : > { %758 = vrot.lane.b32.xlu0 %v641_v10, %s2443_s12 }
 0x165   : > { %2006 = vmatmul.mubr.msk.bf16.vlgmr.msra.gmra.mrb[8].mxu1 %vm796_vm2, %v764_v20 }
 0x166   : > { %2017 = vmatprep.mubr.msk.bf16.mxu1 %vm2440_vm0, %v2439_v0 }
 0x1c7   : > { %v756_v21 = vpop.permute.xlu1 %755 }
 0x1c8   : > { %v765_v30 = vpack.c.bf16 %v756_v21, %v756_v21 }
 0x1cd   : > { %v770_v22 = vpop.permute.xlu0 %769  ;;  %v776_v25 = vpop.permute.xlu1 %775 }
 0x1ce   : > { %v779_v23 = vpack.c.bf16 %v770_v22, %v770_v22  ;;  %v781_v28 = vpack.c.bf16 %v776_v25, %v776_v25 }
 0x1d0   : > { %v847_v24 = vsel %vm796_vm2, %v779_v23, 0  ;;  %v939_v32 = vsel %vm796_vm2, %v781_v28, 0 }
 0x1d1   : > { %2010 = vmatpush3.bf16.xpose.msra.mxu0 %v847_v24  ;;  %v773_v26 = vpop.permute.xlu0 %772  ;;  %v762_v34 = vpop.permute.xlu1 %761 }
 0x1d2   : > { %v780_v27 = vpack.c.bf16 %v773_v26, %v773_v26  ;;  %2021 = vmatprep.subr.bf16.mxu0 %v2439_v0  ;;  %v767_v35 = vpack.c.bf16 %v762_v34, %v762_v34 }
 0x1d4   : > { %v893_v29 = vsel %vm796_vm2, %v780_v27, 0 }
 0x1d5   : > { %2016 = vmatpush3.bf16.xpose.msra.mxu1 %v893_v29  ;;  %v759_v31 = vpop.permute.xlu0 %758 }
 0x1d6   : > { %2027 = vmatprep.subr.bf16.mxu1 %v2439_v0  ;;  %v766_v33 = vpack.c.bf16 %v759_v31, %v759_v31 }
 0x1d8   : > { %2012 = vmatmul.mubr.msk.bf16.vlgmr.msra.gmra.mrb[4].mxu0 %vm796_vm2, %v765_v30 }
 0x1d9   : > { %2022 = vmatpush3.bf16.xpose.msra.mxu0 %v939_v32  ;;  %2023 = vmatprep.mubr.msk.bf16.mxu0 %vm2440_vm0, %v2439_v0 }
 0x1da   : > { %2033 = vmatprep.subr.bf16.mxu0 %v2439_v0 }
 0x1dc   : > { %2018 = vmatmul.mubr.msk.bf16.vlgmr.msra.gmra.mrb[12].mxu1 %vm796_vm2, %v766_v33 }
 0x1dd   : > { %2029 = vmatprep.mubr.msk.bf16.mxu1 %vm2440_vm0, %v2439_v0  ;;  %2028 = vmatpush3.bf16.msra.mxu1 %v1038_v41 }
 0x1de   : > { %2039 = vmatprep.subr.bf16.mxu1 %v2439_v0 }
 0x1e0   : > { %2024 = vmatmul.mubr.msk.bf16.vlgmr.msra.gmra.mrb[8].mxu0 %vm796_vm2, %v767_v35 }
 0x1e1   : > { %2035 = vmatprep.mubr.msk.bf16.mxu0 %vm2440_vm0, %v2439_v0 }
 0x238   : > { %v837_v42 = vpop.f32.mrb[8].mxu1 }
 0x239   : > { %v2007_v43 = vpop.f32.mrb[9].mxu1  ;;  %v981_v44 = vsel %vm796_vm2, %v837_v42, -inf }
 0x23a   : > { %982 = vmax.xlane.f32.xlu0 %v981_v44  ;;  %v840_v45 = vpop.f32.mrb[10].mxu1  ;;  %v1230_v44 = vsel %vm1036_vm3, %v1222_v39, 0 }
 0x23b   : > { %v2008_v46 = vpop.f32.mrb[11].mxu1 }
 0x2ab   : > { %v883_v47 = vpop.f32.mrb[4].mxu0 }
 0x2ac   : > { %v2013_v48 = vpop.f32.mrb[5].mxu0  ;;  %v984_v49 = vsel %vm796_vm2, %v883_v47, -inf }
 0x2ad   : > { %985 = vmax.xlane.f32.xlu1 %v984_v49  ;;  %v886_v50 = vpop.f32.mrb[6].mxu0 }
 0x2ae   : > { %v2014_v51 = vpop.f32.mrb[7].mxu0 }
 0x2af   : > { %v929_v52 = vpop.f32.mrb[12].mxu1 }
 0x2b0   : > { %v2019_v53 = vpop.f32.mrb[13].mxu1  ;;  %v987_v54 = vsel %vm796_vm2, %v929_v52, -inf }
 0x2b1   : > { %988 = vmax.xlane.f32.xlu0 %v987_v54  ;;  %v932_v55 = vpop.f32.mrb[14].mxu1 }
 0x2b2   : > { %v2020_v56 = vpop.f32.mrb[15].mxu1 }
 0x2b3   : > { %v975_v57 = vpop.f32.mrb[8].mxu0 }
 0x2b4   : > { %v2025_v58 = vpop.f32.mrb[9].mxu0  ;;  %v990_v59 = vsel %vm796_vm2, %v975_v57, -inf }
 0x2b5   : > { %v978_v60 = vpop.f32.mrb[10].mxu0  ;;  %991 = vmax.xlane.f32.xlu0 %v990_v59  ;;  %v1225_v59 = vld [vmem:[#allocation5 + $0xc] sm:$0xf] }
 0x2b6   : > { %v2026_v61 = vpop.f32.mrb[11].mxu0 }
 0x2be   : > { %783 = vrot.lane.b32.xlu1 %v2761_v36, %s2441_s20  ;;  %s2888_s20 = scalar_lea.sflag [#allocation10], %s1686_s16 }
 0x2c7   : > { %v983_v62 = vpop.xlane.xlu0 %982 }
 0x2c8   : > { %v993_v63 = vsub.f32 %v837_v42, %v983_v62 }
 0x2ca   : > { %v997_v1 = vmul.f32 1.442695, %v993_v63  ;;  %v1368_v63 = vsel %vm1036_vm3, %v1225_v59, 0  ;;  %v1916_v59 = vld [vmem:[%s3000_s11] ss:$0 sm:$0xff] }
 0x2cc   : > { %2196 = vpow2.f32 %v997_v1 }
 0x2d6   : > { %v2197_v2 = vpop.eup %2196 }
 0x2d7   : > { %v1005_v4 = vsel %vm796_vm2, %v2197_v2, 0.0 }
 0x2e2   : > { %1006 = vadd.xlane.f32.xlu1 %v1005_v4 }
 0x33a   : > { %v986_v5 = vpop.xlane.xlu1 %985 }
 0x33b   : > { %v994_v6 = vsub.f32 %v883_v47, %v986_v5  ;;  %v1223_v47 = vld [vmem:[#allocation5 + $0x4] sm:$0xf] }
 0x33c   : > { %v1276_v50 = vsel %vm1036_vm3, %v1223_v47, 0 }
 0x33d   : > { %v999_v7 = vmul.f32 1.442695, %v994_v6 }
 0x33e   : > { %v784_v8 = vpop.permute.xlu1 %783  ;;  %v989_v9 = vpop.xlane.xlu0 %988 }
 0x33f   : > { %2198 = vpow2.f32 %v999_v7  ;;  %v793_v10 = vpack.c.bf16 %v784_v8, %v784_v8  ;;  %v995_v11 = vsub.f32 %v929_v52, %v989_v9  ;;  %v1224_v52 = vld [vmem:[#allocation5 + $0x8] sm:$0xf] }
 0x340   : > { %v1322_v56 = vsel %vm1036_vm3, %v1224_v52, 0  ;;  %v2193_v52 = vld [vmem:[%s2997_s8 + $0x8] sm:$0xff]  }
 0x341   : > { %v1084_v12 = vsel %vm1036_vm3, %v793_v10, 0  ;;  %v1001_v13 = vmul.f32 1.442695, %v995_v11 }
 0x342   : > { %2034 = vmatpush3.bf16.msra.mxu0 %v1084_v12  ;;  %v992_v14 = vpop.xlane.xlu0 %991 }
 0x343   : > { %2200 = vpow2.f32 %v1001_v13  ;;  %v996_v15 = vsub.f32 %v975_v57, %v992_v14  ;;  %2045 = vmatprep.subr.bf16.mxu0 %v2439_v0 }
 0x345   : > { %v1003_v16 = vmul.f32 1.442695, %v996_v15 }
 0x347   : > { %2202 = vpow2.f32 %v1003_v16 }
 0x349   : > { %v2199_v17 = vpop.eup %2198 }
 0x34a   : > { %v1008_v18 = vsel %vm796_vm2, %v2199_v17, 0.0 }
 0x34b   : > { %1009 = vadd.xlane.f32.xlu0 %v1008_v18 }
 0x34d   : > { %v2201_v19 = vpop.eup %2200 }
 0x34e   : > { %v1011_v20 = vsel %vm796_vm2, %v2201_v19, 0.0 }
 0x34f   : > { %1012 = vadd.xlane.f32.xlu1 %v1011_v20 }
 0x351   : > { %v2203_v21 = vpop.eup %2202 }
 0x352   : > { %v1014_v22 = vsel %vm796_vm2, %v2203_v21, 0.0 }
 0x353   : > { %1015 = vadd.xlane.f32.xlu0 %v1014_v22 }
 0x360   : > { %789 = vrot.lane.b32.xlu1 %v2761_v36, %s2442_s26  ;;  %s2302_s26 = scalar_lea.vmem %s2876_s13, 512 }
 0x361   : > { %p2303_p12 = scmp.ne.s32.totalorder %s2876_s13, %s2302_s26 }
 0x363   : > { %p2304_p8 = pnand %p2303_p12, %p3046_p7 }
 0x365   : > { %p2305_p11 = pneg %p2304_p8 }
 0x369   : > { %786 = vrot.lane.b32.xlu0 %v2761_v36, %s2443_s12 }
 0x36f   : > { %v1007_v23 = vpop.xlane.xlu1 %1006 }
 0x370   : > { %2204 = vrcp.f32 %v1007_v23 }
 0x37a   : > { %v2205_v24 = vpop.eup %2204 }
 0x37b   : > { %v1021_v25 = vmul.f32 %v2205_v24, %v2197_v2 }
 0x37d   : > { %v1029_v26 = vpack.c.bf16 %v1021_v25, %v1021_v25  ;;  %1025 = vst.msk [vmem:[%s2787_s18] sm:$0xff] %vm796_vm2, %v1021_v25 }
 0x37f   : > { %2030 = vmatmul.mubr.msk.bf16.vlgmr.msra.gmra.mrb[16].mxu1 %vm796_vm2, %v1029_v26 }
 0x380   : > { %2041 = vmatprep.mubr.msk.bf16.mxu1 %vm2440_vm0, %v2439_v0 }
 0x3d8   : > { %v1010_v27 = vpop.xlane.xlu0 %1009 }
 0x3d9   : > { %2206 = vrcp.f32 %v1010_v27 }
 0x3dc   : > { %v1013_v28 = vpop.xlane.xlu1 %1012 }
 0x3dd   : > { %2208 = vrcp.f32 %v1013_v28 }
 0x3e0   : > { %v1016_v29 = vpop.xlane.xlu0 %1015  ;;  %v790_v30 = vpop.permute.xlu1 %789 }
 0x3e1   : > { %2210 = vrcp.f32 %v1016_v29  ;;  %v795_v33 = vpack.c.bf16 %v790_v30, %v790_v30 }
 0x3e3   : > { %v2207_v31 = vpop.eup %2206  ;;  %v1176_v41 = vsel %vm1036_vm3, %v795_v33, 0  ;;  %v1914_v33 = vld [vmem:[%s2994_s5] ss:$0 sm:$0xff] }
 0x3e4   : > { %v1022_v32 = vmul.f32 %v2207_v31, %v2199_v17  ;;  %v787_v34 = vpop.permute.xlu0 %786 }
 0x3e5   : > { %v794_v35 = vpack.c.bf16 %v787_v34, %v787_v34 }
 0x3e6   : > { %v1030_v36 = vpack.c.bf16 %v1022_v32, %v1022_v32  ;;  %1026 = vst.msk [vmem:[%s2787_s18 + $0x8] sm:$0xff] %vm796_vm2, %v1022_v32  ;;  %v1421_v42 = vadd.f32 %v1022_v32, %v1021_v25 }
 0x3e7   : > { %v2209_v37 = vpop.eup %2208  ;;  %v1130_v38 = vsel %vm1036_vm3, %v794_v35, 0 }
 0x3e8   : > { %v1023_v40 = vmul.f32 %v2209_v37, %v2201_v19  ;;  %2036 = vmatmul.mubr.msk.bf16.vlgmr.msra.gmra.mrb[12].mxu0 %vm796_vm2, %v1030_v36  ;;  %2040 = vmatpush3.bf16.msra.mxu1 %v1130_v38 }
 0x3e9   : > { %2046 = vmatpush3.bf16.msra.mxu0 %v1176_v41  ;;  %2047 = vmatprep.mubr.msk.bf16.mxu0 %vm2440_vm0, %v2439_v0 }
 0x3ea   : > { %v1031_v43 = vpack.c.bf16 %v1023_v40, %v1023_v40  ;;  %2051 = vmatprep.subr.bf16.mxu1 %v2439_v0  ;;  %2057 = vmatprep.subr.bf16.mxu0 %v2439_v0  ;;  %v1422_v45 = vadd.f32 %v1421_v42, %v1023_v40  ;;  %1027 = vst.msk [vmem:[%s2787_s18 + $0x10] sm:$0xff] %vm796_vm2, %v1023_v40 }
 0x3eb   : > { %v2211_v46 = vpop.eup %2210 }
 0x3ec   : > { %v1024_v48 = vmul.f32 %v2211_v46, %v2203_v21  ;;  %2042 = vmatmul.mubr.msk.bf16.vlgmr.msra.gmra.mrb[20].mxu1 %vm796_vm2, %v1031_v43 }
 0x3ed   : > { %2052 = vmatpush3.bf16.msra.mxu1 %v1230_v44  ;;  %2053 = vmatprep.mubr.msk.bf16.mxu1 %vm2440_vm0, %v2439_v0 }
 0x3ee   : > { %v1032_v49 = vpack.c.bf16 %v1024_v48, %v1024_v48  ;;  %2063 = vmatprep.subr.bf16.mxu1 %v2439_v0  ;;  %v1423_v51 = vadd.f32 %v1422_v45, %v1024_v48  ;;  %1028 = vst.msk [vmem:[%s2787_s18 + $0x18] sm:$0xff] %vm796_vm2, %v1024_v48  ;;  %s2444_s18 = smov [#allocation9]  }
 0x3ef   : > { %s2306_s12 = sshll.u32 %s2444_s18, 4  ;;  %s2307_s12 = int_to_ptr.vmem [resolvable:$false] %s2306_s12 }
 0x3f0   : > { %2048 = vmatmul.mubr.msk.bf16.vlgmr.msra.gmra.mrb[16].mxu0 %vm796_vm2, %v1032_v49  ;;  %v1424_v18 = vmul.f32 0.25, %v1423_v51  ;;  %v2191_v51 = vld [vmem:[#allocation7 + $0x8] sm:$0xff]   ;;  %s2308_s23 = scalar_lea.vmem %s2307_s12, 1024  ;;  %p2309_p13 = scmp.lt.s32.totalorder %s2876_s13, %s2307_s12 }
 0x3f1   : > { %2058 = vmatpush3.bf16.msra.mxu0 %v1276_v50  ;;  %2059 = vmatprep.mubr.msk.bf16.mxu0 %vm2440_vm0, %v2439_v0  ;;  %v2190_v50 = vld [vmem:[#allocation7] sm:$0xff]   ;;  %p2310_p1 = scmp.lt.s32.totalorder %s2308_s23, %s2302_s26 }
 0x3f2   : > { %2069 = vmatprep.subr.bf16.mxu0 %v2439_v0  ;;  %v1425_v19 = vadd.f32 1e-08, %v1424_v18 }
 0x3f3   : > { %p2311_p6 = por %p2310_p1, %p2309_p13 }
 0x3f4   : > { %v1426_v20 = vmul.f32 7.9999995, %v1425_v19 }
 0x3f5   : > { %p2312_p9 = pnand %p2311_p6, %p2305_p11 }
 0x3f6   : > { %2212 = vlog2.f32 %v1426_v20 }
 0x400   : > { %v2213_v31 = vpop.eup %2212 }
 0x401   : > { %v1428_v39 = vmul.f32 0.6931472, %v2213_v31 }
 0x403   : > { %v1429_v42 = vmul.f32 %v1428_v39, %v1425_v19 }
 0x405   : > { %v1430_v43 = vsel %vm796_vm2, %v1429_v42, 0.0 }
 0x452   : > { %v1074_v53 = vpop.f32.mrb[16].mxu1 }
 0x453   : > { %v1218_v54 = vpack.c.bf16 %v1074_v53, %v1074_v53  ;;  %v2031_v55 = vpop.f32.mrb[17].mxu1 }
 0x454   : > { %v1077_v57 = vpop.f32.mrb[18].mxu1 }
 0x455   : > { %v2032_v58 = vpop.f32.mrb[19].mxu1  ;;  %2054 = vmatmul.mubr.msk.bf16.vlgmr.msra.gmra.mrb[24].mxu1 %vm796_vm2, %v1218_v54  ;;  %v1915_v57 = vld [vmem:[%s2999_s10] ss:$0 sm:$0xff] }
 0x456   : > { %2064 = vmatpush3.bf16.msra.mxu1 %v1322_v56  ;;  %2065 = vmatprep.mubr.msk.bf16.mxu1 %vm2440_vm0, %v2439_v0 }
 0x457   : > { %2075 = vmatprep.subr.bf16.mxu1 %v2439_v0 }
 0x4bb   : > { %v1120_v60 = vpop.f32.mrb[12].mxu0 }
 0x4bc   : > { %v1219_v61 = vpack.c.bf16 %v1120_v60, %v1120_v60  ;;  %v2037_v62 = vpop.f32.mrb[13].mxu0 }
 0x4bd   : > { %v1123_v1 = vpop.f32.mrb[14].mxu0 }
 0x4be   : > { %v2038_v2 = vpop.f32.mrb[15].mxu0  ;;  %2060 = vmatmul.mubr.msk.bf16.vlgmr.msra.gmra.mrb[20].mxu0 %vm796_vm2, %v1219_v61  ;;  %v2195_v1 = vld [vmem:[%s2997_s8 + $0x18] sm:$0xff]  }
 0x4bf   : > { %v1166_v4 = vpop.f32.mrb[20].mxu1  ;;  %2070 = vmatpush3.bf16.msra.mxu0 %v1368_v63  ;;  %2071 = vmatprep.mubr.msk.bf16.mxu0 %vm2440_vm0, %v2439_v0  ;;  %v2194_v63 = vld [vmem:[%s2997_s8 + $0x10] sm:$0xff]   ;;  %v1917_v2 = vld [vmem:[%s2996_s7] ss:$0 sm:$0xff] }
 0x4c0   : > { %v1220_v5 = vpack.c.bf16 %v1166_v4, %v1166_v4  ;;  %v2043_v6 = vpop.f32.mrb[21].mxu1  ;;  %2083 = vmatprep.subr.bf16.mxu0 %v2439_v0 }
 0x4c1   : > { %v1169_v7 = vpop.f32.mrb[22].mxu1 }
 0x4c2   : > { %v2044_v8 = vpop.f32.mrb[23].mxu1  ;;  %2066 = vmatmul.mubr.msk.bf16.vlgmr.msra.gmra.mrb[28].mxu1 %vm796_vm2, %v1220_v5 }
 0x4c3   : > { %v1212_v9 = vpop.f32.mrb[16].mxu0  ;;  %2079 = vmatprep.mubr.msk.bf16.mxu1 %vm2440_vm0, %v2439_v0  ;;  %2076 = vmatpush3.bf16.msra.mxu1 %v2190_v50 }
 0x4c4   : > { %v1221_v10 = vpack.c.bf16 %v1212_v9, %v1212_v9  ;;  %v2049_v11 = vpop.f32.mrb[17].mxu0  ;;  %2077 = vmatprep.subr.bf16.mxu1 %v2439_v0 }
 0x4c5   : > { %v1215_v12 = vpop.f32.mrb[18].mxu0 }
 0x4c6   : > { %v2050_v13 = vpop.f32.mrb[19].mxu0  ;;  %2072 = vmatmul.mubr.msk.bf16.vlgmr.msra.gmra.mrb[24].mxu0 %vm796_vm2, %v1221_v10 }
 0x4c7   : > { %2091 = vmatprep.mubr.msk.bf16.mxu0 %vm2440_vm0, %v2439_v0  ;;  %2078 = vmatpush3.bf16.msra.mxu1 %v2191_v51 }
 0x528   : > { %v1266_v14 = vpop.f32.mrb[24].mxu1 }
 0x529   : > { %v2055_v15 = vpop.f32.mrb[25].mxu1 }
 0x52a   : > { %v1269_v16 = vpop.f32.mrb[26].mxu1 }
 0x52b   : > { %v2056_v17 = vpop.f32.mrb[27].mxu1 }
 0x591   : > { %v1312_v21 = vpop.f32.mrb[20].mxu0 }
 0x592   : > { %v1410_v22 = vadd.f32 %v1312_v21, %v1266_v14  ;;  %v2061_v23 = vpop.f32.mrb[21].mxu0 }
 0x593   : > { %v1315_v24 = vpop.f32.mrb[22].mxu0 }
 0x594   : > { %v2062_v25 = vpop.f32.mrb[23].mxu0 }
 0x595   : > { %v1358_v26 = vpop.f32.mrb[28].mxu1 }
 0x596   : > { %v1411_v27 = vadd.f32 %v1410_v22, %v1358_v26  ;;  %v2067_v28 = vpop.f32.mrb[29].mxu1 }
 0x597   : > { %v1361_v29 = vpop.f32.mrb[30].mxu1 }
 0x598   : > { %v2068_v30 = vpop.f32.mrb[31].mxu1 }
 0x599   : > { %v1404_v32 = vpop.f32.mrb[24].mxu0 }
 0x59a   : > { %v1412_v34 = vadd.f32 %v1411_v27, %v1404_v32  ;;  %v2073_v35 = vpop.f32.mrb[25].mxu0 }
 0x59b   : > { %v1407_v36 = vpop.f32.mrb[26].mxu0 }
 0x59c   : > { %v1420_v37 = vadd.f32 %v1914_v33, %v1412_v34  ;;  %v2074_v38 = vpop.f32.mrb[27].mxu0 }
 0x59e   : > { %v1467_v40 = vadd.f32 %v1420_v37, %v2710_v3  ;;  %v2192_v3 = vld [vmem:[%s2997_s8] sm:$0xff]  }
 0x59f   : > { %2084 = vmatpush3.bf16.msra.mxu0 %v2192_v3 }
 0x5a0   : > { %v1470_v41 = vsel %vm597_vm1, %v1467_v40, 0.0  ;;  %2085 = vmatprep.subr.bf16.mxu0 %v2439_v0 }
 0x5a1   : > { %1471 = vadd.xlane.f32.xlu1 %v1470_v41 }
 0x5a3   : > { %2086 = vmatpush3.bf16.msra.mxu0 %v2193_v52 }
 0x5a4   : > { %2087 = vmatprep.subr.bf16.mxu0 %v2439_v0 }
 0x5a5   : > { %1431 = vadd.xlane.f32.xlu1 %v1430_v43 }
 0x5a7   : > { %2088 = vmatpush3.bf16.msra.mxu0 %v2194_v63 }
 0x5a8   : > { %2089 = vmatprep.subr.bf16.mxu0 %v2439_v0  ;;  %v1921_v0 = vld [vmem:[%s2998_s9] ss:$0 sm:$0xff] }
 0x5ab   : > { %2090 = vmatpush3.bf16.msra.mxu0 %v2195_v1 }
 0x62e   : > { %v1472_v44 = vpop.xlane.xlu1 %1471 }
 0x62f   : > { %v1474_v45 = vmul.f32 0.03125, %v1472_v44 }
 0x631   : > { %v1475_v46 = vsub.f32 %v1467_v40, %v1474_v45 }
 0x632   : > { %v1432_v47 = vpop.xlane.xlu1 %1431 }
 0x633   : > { %1433 = vxpose.xlu1.b32.start.end [1/1] (short) (narrow) %v1432_v47, 8  ;;  %v1476_v48 = vmul.f32 %v1475_v46, %v1475_v46 }
 0x635   : > { %v1477_v49 = vsel %vm597_vm1, %v1476_v48, 0.0 }
 0x636   : > { %1478 = vadd.xlane.f32.xlu0 %v1477_v49 }
 0x6b3   : > { %v1449_v23 = vpop.trf.xlu1 }
 0x6b4   : > { %1466 = vst.msk [vmem:[%s573_s15] sm:$0x1] %vm1465_vm5, %v1449_v23 }
 0x6c3   : > { %v1479_v53 = vpop.xlane.xlu0 %1478 }
 0x6c4   : > { %v1480_v54 = vmul.f32 0.03125, %v1479_v53 }
 0x6c6   : > { %v1481_v55 = vadd.f32 1e-05, %v1480_v54 }
 0x6c8   : > { %2214 = vrsqrt.f32 %v1481_v55 }
 0x6d2   : > { %v2215_v56 = vpop.eup %2214 }
 0x6d3   : > { %v1483_v58 = vmul.f32 %v2215_v56, %v1475_v46 }
 0x6d5   : > { %v1490_v60 = vmul.f32 %v1915_v57, %v1483_v58 }
 0x6d7   : > { %v1497_v61 = vadd.f32 %v1916_v59, %v1490_v60 }
 0x6d9   : > { %v1498_v62 = vpack.c.bf16 %v1497_v61, %v1497_v61 }
 0x6db   : > { %2080 = vmatmul.mubr.msk.bf16.vlgmr.msra.gmra.mrb[32].mxu1 %vm597_vm1, %v1498_v62 }
 0x7ae   : > { %v1559_v4 = vpop.f32.mrb[32].mxu1 }
 0x7af   : > { %v1560_v5 = vadd.f32 %v1917_v2, %v1559_v4  ;;  %v2081_v6 = vpop.f32.mrb[33].mxu1 }
 0x7b0   : > { %v1562_v7 = vpop.f32.mrb[34].mxu1 }
 0x7b1   : > { %v1565_v8 = vmax.f32 %v1560_v5, 0.0  ;;  %v2082_v9 = vpop.f32.mrb[35].mxu1 }
 0x7b3   : > { %v1566_v10 = vpack.c.bf16 %v1565_v8, %v1565_v8 }
 0x7b5   : > { %2092 = vmatmul.mubr.msk.bf16.vlgmr.msra.gmra.mrb[28].mxu0 %vm1606_vm4, %v1566_v10 }
 0x888   : > { %v1644_v11 = vpop.f32.mrb[28].mxu0 }
 0x889   : > { %v1645_v12 = vadd.f32 %v1921_v0, %v1644_v11  ;;  %v2093_v13 = vpop.f32.mrb[29].mxu0 }
 0x88a   : > { %v1647_v14 = vpop.f32.mrb[30].mxu0 }
 0x88b   : > { %v2094_v15 = vpop.f32.mrb[31].mxu0  ;;  %v1650_v16 = vadd.f32 %v1645_v12, %v1497_v61 }
 0x88d   : > { %v1653_v17 = vsel %vm597_vm1, %v1650_v16, 0.0 }
 0x88e   : > { %1654 = vadd.xlane.f32.xlu0 %v1653_v17 }
 0x91b   : > { %v1655_v18 = vpop.xlane.xlu0 %1654 }
 0x91c   : > { %v1656_v19 = vmul.f32 0.03125, %v1655_v18 }
 0x91e   : > { %v2870_v20 = vsub.f32 %v1650_v16, %v1656_v19 }
 0x920   : > { %v1658_v21 = vmul.f32 %v2870_v20, %v2870_v20 }
 0x922   : > { %v1659_v22 = vsel %vm597_vm1, %v1658_v21, 0.0 }
 0x923   : > { %1660 = vadd.xlane.f32.xlu0 %v1659_v22 }
 0x924   : > { %2315 = shalt.err (!%p2312_p9)
}
 0x925   : > { %s2316_s28 = scalar_lea.hbm %s2886_s24, 512  ;;  %s2320_s16 = scalar_lea.hbm %s3045_s30, 1024 }
 0x926   : > { %p2317_p2 = scmp.ne.s32.totalorder %s2886_s24, %s2316_s28  ;;  %p2321_p5 = scmp.lt.u32.totalorder %s2886_s24, %s3045_s30 }
 0x927   : > { %p2322_p10 = scmp.lt.u32.totalorder %s2320_s16, %s2316_s28  ;;  %p2324_p12 = scmp.lt.u32.totalorder %s2316_s28, %s2886_s24 }
 0x928   : > { %p2318_p0 = pnand %p2317_p2, %p3046_p7 }
 0x929   : > { %p2323_p4 = por %p2322_p10, %p2321_p5 }
 0x92a   : > { %p2319_p3 = pneg %p2318_p0 }
 0x92b   : > { %p2325_p8 = por %p2324_p12, %p2323_p4 }
 0x92d   : > { %p2326_p11 = pnand %p2325_p8, %p2319_p3 }
 0x92f   : > { %2329 = shalt.err (!%p2326_p11)
}
 0x930   : > { %s2445_s29 = smov 128   ;;  %s2446_s26 = smov 8  }
 0x931   : > { %2108 = dma.vmem_to_hbm [thread:$0]  (%p3046_p7), %s2876_s13, 512, %s2886_s24, %s2888_s20, %s2445_s29, %s2445_s29, %s2446_s26  }
 0x932   : > { %s1733_s18 = sshll.u32 %s573_s15, 4  ;;  %s1934_s12 = sshll.u32 %s2555_s25, 4  ;;  %s1734_s18 = int_to_ptr.vmem [resolvable:$true] %s1733_s18 }
 0x933   : > { %s3047_s28 = sld [smem:[#allocation28_spill]]  ;;  %s2330_s16 = scalar_lea.vmem %s1734_s18, 16 }
 0x934   : > { %p2331_p13 = scmp.ne.s32.totalorder %s1734_s18, %s2330_s16  ;;  %s2447_s17 = smov [#allocation11]  }
 0x935   : > { %s2334_s19 = sshll.u32 %s2447_s17, 4  ;;  %s2335_s19 = int_to_ptr.vmem [resolvable:$false] %s2334_s19 }
 0x936   : > { %p2332_p1 = pnand %p2331_p13, %p3046_p7  ;;  %s2336_s1 = scalar_lea.vmem %s2335_s19, 32 }
 0x937   : > { %p2337_p9 = scmp.lt.s32.totalorder %s1734_s18, %s2335_s19  ;;  %p2338_p2 = scmp.lt.s32.totalorder %s2336_s1, %s2330_s16 }
 0x938   : > { %p2333_p6 = pneg %p2332_p1 }
 0x939   : > { %s1731_s21 = scalar_lea.hbm %s3047_s28, %s1934_s12  ;;  %p2339_p0 = por %p2338_p2, %p2337_p9 }
 0x93b   : > { %p2340_p3 = pnand %p2339_p0, %p2333_p6 }
 0x93d   : > { %2343 = shalt.err (!%p2340_p3)
}
 0x93e   : > { %s2344_s13 = scalar_lea.hbm %s1731_s21, 16  ;;  %s2348_s29 = scalar_lea.hbm %s3047_s28, 32 }
 0x93f   : > { %p2345_p5 = scmp.ne.s32.totalorder %s1731_s21, %s2344_s13  ;;  %p2349_p12 = scmp.lt.u32.totalorder %s1731_s21, %s3047_s28 }
 0x940   : > { %p2350_p8 = scmp.lt.u32.totalorder %s2348_s29, %s2344_s13  ;;  %p2352_p13 = scmp.lt.u32.totalorder %s2344_s13, %s1731_s21 }
 0x941   : > { %p2346_p10 = pnand %p2345_p5, %p3046_p7 }
 0x942   : > { %p2351_p11 = por %p2350_p8, %p2349_p12 }
 0x943   : > { %p2347_p4 = pneg %p2346_p10 }
 0x944   : > { %p2353_p1 = por %p2352_p13, %p2351_p11 }
 0x946   : > { %p2354_p6 = pnand %p2353_p1, %p2347_p4 }
 0x948   : > { %2357 = shalt.err (!%p2354_p6)
}
 0x949   : > { %2109 = dma.vmem_to_hbm [thread:$0]  (%p3046_p7), %s1734_s18, 16, %s1731_s21, %s2888_s20  }
 0x94a   : > { %s1890_s1 = sshll.u32 %s2784_s14, 3  ;;  %s3048_s16 = sld [smem:[#allocation24_spill]] }
 0x94b   : > { %s3049_s13 = sld [smem:[#allocation25_spill]]  ;;  %s1931_s15 = sshll.u32 %s2555_s25, 7 }
 0x94c   : > { %s560_s20 = scalar_lea.vmem [#allocation8], %s1890_s1  ;;  %s3050_s29 = sld [smem:[#allocation26_spill]] }
 0x94d   : > { %s1704_s18 = sshll.u32 %s560_s20, 4  ;;  %s1682_s12 = scalar_lea.sflag [#allocation4], %s2784_s14  ;;  %s2945_s18 = int_to_ptr.vmem [resolvable:$true] %s1704_s18 }
 0x94e   : > { %s2358_s23 = scalar_lea.vmem %s2945_s18, 128  ;;  %s2448_s25 = smov [#allocation8]  }
 0x94f   : > { %p2359_p9 = scmp.ne.s32.totalorder %s2945_s18, %s2358_s23  ;;  %s2362_s1 = sshll.u32 %s2448_s25, 4  ;;  %s2363_s1 = int_to_ptr.vmem [resolvable:$false] %s2362_s1 }
 0x950   : > { %v1927_v28 = vld [vmem:[%s3048_s16] ss:$0 sm:$0xff]  ;;  %s2364_s27 = scalar_lea.vmem %s2363_s1, 256  ;;  %p2365_p3 = scmp.lt.s32.totalorder %s2945_s18, %s2363_s1 }
 0x951   : > { %v1928_v30 = vld [vmem:[%s3049_s13] ss:$0 sm:$0xff]  ;;  %p2360_p2 = pnand %p2359_p9, %p3046_p7  ;;  %p2366_p5 = scmp.lt.s32.totalorder %s2364_s27, %s2358_s23 }
 0x952   : > { %s2943_s26 = scalar_lea.hbm %s3050_s29, %s1931_s15 }
 0x953   : > { %p2361_p0 = pneg %p2360_p2  ;;  %p2367_p10 = por %p2366_p5, %p2365_p3 }
 0x955   : > { %p2368_p4 = pnand %p2367_p10, %p2361_p0 }
 0x9b0   : > { %v1661_v24 = vpop.xlane.xlu0 %1660 }
 0x9b1   : > { %v1662_v25 = vmul.f32 0.03125, %v1661_v24 }
 0x9b3   : > { %v1663_v26 = vadd.f32 1e-05, %v1662_v25 }
 0x9b5   : > { %2216 = vrsqrt.f32 %v1663_v26 }
 0x9bf   : > { %v2217_v27 = vpop.eup %2216 }
 0x9c0   : > { %v1665_v29 = vmul.f32 %v2217_v27, %v2870_v20 }
 0x9c2   : > { %v1672_v31 = vmul.f32 %v1927_v28, %v1665_v29 }
 0x9c4   : > { %v1679_v32 = vadd.f32 %v1928_v30, %v1672_v31 }
 0x9c6   : > { %1680 = vst.msk [vmem:[%s560_s20] sm:$0xff] %vm597_vm1, %v1679_v32 }
 0x9c7   : > { %2371 = shalt.err (!%p2368_p4)
}
 0x9c8   : > { %s2372_s14 = scalar_lea.hbm %s2943_s26, 128  ;;  %s2376_s19 = scalar_lea.hbm %s3050_s29, 256 }
 0x9c9   : > { %p2373_p12 = scmp.ne.s32.totalorder %s2943_s26, %s2372_s14  ;;  %p2377_p13 = scmp.lt.u32.totalorder %s2943_s26, %s3050_s29 }
 0x9ca   : > { %p2378_p1 = scmp.lt.u32.totalorder %s2376_s19, %s2372_s14  ;;  %p2380_p9 = scmp.lt.u32.totalorder %s2372_s14, %s2943_s26 }
 0x9cb   : > { %p2374_p8 = pnand %p2373_p12, %p3046_p7 }
 0x9cc   : > { %p2379_p6 = por %p2378_p1, %p2377_p13 }
 0x9cd   : > { %p2375_p11 = pneg %p2374_p8 }
 0x9ce   : > { %p2381_p2 = por %p2380_p9, %p2379_p6 }
 0x9d0   : > { %p2382_p0 = pnand %p2381_p2, %p2375_p11 }
 0x9d2   : > { %2385 = shalt.err (!%p2382_p0)
}
 0x9d3   : > { %2107 = dma.vmem_to_hbm [thread:$0]  (%p3046_p7), %s2945_s18, 128, %s2943_s26, %s1682_s12  }
 0x9d4 PF: > { %s3051_s20 = sld [smem:[#allocation18_spill]]  ;;  %s3052_s21 = sld [smem:[#allocation16_spill]] }
 0x9d5   : > { %s3053_s24 = sld [smem:[#allocation21_spill]] }
 0x9da   : > { %p2139_p3 = scmp.ge.s32.totalorder %s3051_s20, 2  ;;  %s1745_s23 = sand.u32 1, %s3052_s21  }
 0x9db   : > { %p3054_p5 = scmp.ne.s32.totalorder %s3053_s24, 0  ;;  %s1746_s25 = scalar_lea.sflag [#allocation4], %s1745_s23 }
 0x9dd   : > { %p2124_p10 = pnand %p2139_p3, %p3054_p5 }
 0x9df   : > { %2411 = dma.done.wait (!%p2124_p10), %s1746_s25, 128  }
 0x9e0   : > { %2413 = vsyncadd (!%p2124_p10), %s1746_s25, 4294967168  ;;  %s3055_s1 = sadd.s32 4294967294, %s3051_s20  }
 0x9e1   : > { %s1754_s27 = sand.u32 1, %s3055_s1  }
 0x9e2   : > { %s1755_s14 = scalar_lea.sflag [#allocation10], %s1754_s27 }
 0x9e3   : > { %2415 = dma.done.wait (!%p2124_p10), %s1755_s14, 528  }
 0x9e4   : > { %2417 = vsyncadd (!%p2124_p10), %s1755_s14, 4294966768  ;;  %s3056_s24 = sld [smem:[#allocation19_spill]]  ;;  %s3057_s0 = sld [smem:[#allocation17_spill]] }
 0x9e5   : > { %s3058_s23 = sld [smem:[#allocation20_spill]]  ;;  %s3059_s21 = smov %s2424_s22 }
 0x9ea   : > { %p32_p7 = scmp.ge.s32.totalorder %s3056_s24, 4   ;;  %s3060_s22 = smov %s3057_s0 }
 0x9ec   :  { %34 = sbr.rel (!%p32_p7) target bundleno = 15 (0xf), region = 156 }
 0x9f3   :  { %1768 = vsyncpa [#allocation3], 1 }
 0x9f4   :  { %1770 = vsyncpa [#allocation3 + $0x1], 1 }
 0x9f5   :  { %1771 = vsyncpa [#allocation6], 1 }
 0x9f6   :  { %1772 = vsyncpa [#allocation4], 1 }
 0x9f7   :  { %1774 = vsyncpa [#allocation4 + $0x1], 1 }
 0x9f8   :  { %1775 = vsyncpa [#allocation10], 1 }
 0x9f9   :  { %1777 = vsyncpa [#allocation10 + $0x1], 1 }

</bundles_post_ra>
